<compile_context>
chip_gen: v7x
topology: tpu7x:2x2x1
jax: 0.10.0
libtpu: 0.0.40
codegen_flags: <defaults>
</compile_context>

<pallas_src>
import jax
import jax.numpy as jnp
from jax import lax
from jax.experimental import pallas as pl
from jax.experimental.pallas import tpu as pltpu


# ------------------------------ helpers ------------------------------------ #

def _round_up(x, m):
    return ((x + m - 1) // m) * m


def _pad2(w, rows, cols):
    return jnp.pad(w, ((0, rows - w.shape[0]), (0, cols - w.shape[1])))


def _vmem_limit_bytes(tc, b_pad, h_pad, o_pad, n_layers):
    bf2, f4 = 2, 4
    est = 2 * tc * b_pad * h_pad * bf2                      # streamed xw0 chunk (x2 buffers)
    if n_layers > 1:
        est += tc * b_pad * h_pad * bf2                     # hbuf scratch
    est += n_layers * h_pad * h_pad * bf2                   # W_hh (all layers)
    est += (n_layers - 1) * (h_pad * h_pad * bf2 + h_pad * f4)  # W_ih rest + bias
    est += h_pad * o_pad * f4 + o_pad * f4                  # FC weights
    est += n_layers * b_pad * h_pad * f4 + b_pad * o_pad * f4   # resident outputs
    # 2x headroom for compiler temporaries; clamp under v7x's 64 MiB physical VMEM.
    return int(min(max(2 * est + (4 << 20), 16 << 20), 60 << 20))


# --------------------------- fused Pallas kernel ---------------------------- #

def _build_fused_kernel(n_layers, time_chunk, unroll):
    """Fused multi-layer RNN (streamed over time chunks) + FC + sigmoid.

    Ref order (in, out, scratch):
      in:   xw0_chunk (TC,Bp,Hp) bf16, whh0 (Hp,Hp) bf16,
            [wih_l (Hp,Hp) bf16, whh_l (Hp,Hp) bf16, bias_l (1,Hp) f32] for l=1..L-1,
            w_fc (Hp,Op) f32, b_fc (1,Op) f32
      out:  sig (Bp,Op) f32, hT (L,Bp,Hp) f32   (hT doubles as the cross-chunk hidden carry)
      scr:  hbuf (TC,Bp,Hp) bf16   (only if L>1)
    """

    def kernel(*refs):
        it = iter(refs)
        xw0_ref = next(it)
        whh0_ref = next(it)
        wih_rest, whh_rest, bias_rest = [], [], []
        for _ in range(n_layers - 1):
            wih_rest.append(next(it))
            whh_rest.append(next(it))
            bias_rest.append(next(it))
        w_fc_ref = next(it)
        b_fc_ref = next(it)
        sig_ref = next(it)
        hT_ref = next(it)
        hbuf_ref = next(it) if n_layers > 1 else None

        chunk = pl.program_id(0)
        n_chunks = pl.num_programs(0)

        @pl.when(chunk == 0)
        def _():
            hT_ref[...] = jnp.zeros(hT_ref.shape, hT_ref.dtype)

        def run_layer_chunk(src_ref, whh_bf, layer_idx, write_out):
            # src_ref[t]: bf16 preactivation input for step t of this chunk (bias folded in).
            h0 = hT_ref[layer_idx]                      # (Bp,Hp) f32 carry

            def step(t, h_prev):
                pre = src_ref[t].astype(jnp.float32) + jnp.dot(
                    h_prev.astype(jnp.bfloat16), whh_bf,
                    preferred_element_type=jnp.float32)
                h_new = jnp.tanh(pre)                   # add + tanh in f32 (v5e has no bf16 VPU/EUP)
                if write_out:                           # static: top layer never stores per-step outputs
                    hbuf_ref[t] = h_new.astype(jnp.bfloat16)
                return h_new

            h_last = lax.fori_loop(0, time_chunk, step, h0, unroll=unroll)
            hT_ref[layer_idx] = h_last                  # carry to the next chunk

        # ---- layer 0: x @ W_ih0 + b0 was hoisted into the wrapper (streamed in as xw0) ----
        run_layer_chunk(xw0_ref, whh0_ref[...], 0, write_out=(n_layers > 1))

        # ---- layers 1..L-1: chunked in-place input projection, then the recurrence ----
        for l in range(1, n_layers):
            tc, b_pad, h_pad = hbuf_ref.shape
            x = hbuf_ref[...]                                           # (TC,Bp,Hp) bf16
            xw = (jnp.dot(x.reshape(tc * b_pad, h_pad), wih_rest[l - 1][...],
                          preferred_element_type=jnp.float32)
                  + bias_rest[l - 1][...])
            hbuf_ref[...] = xw.reshape(tc, b_pad, h_pad).astype(jnp.bfloat16)  # in place: no xwbuf
            run_layer_chunk(hbuf_ref, whh_rest[l - 1][...], l,
                            write_out=(l < n_layers - 1))

        # ---- last chunk: fused FC + sigmoid on the top layer's final hidden state ----
        @pl.when(chunk == n_chunks - 1)
        def _():
            logits = (jnp.dot(hT_ref[n_layers - 1], w_fc_ref[...],
                              preferred_element_type=jnp.float32) + b_fc_ref[...])
            sig_ref[...] = 1.0 / (1.0 + jnp.exp(-logits))

    return kernel


def fused_rnn_fc_sigmoid(xw0, whh0_bf, wih_rest_bf, whh_rest_bf, bias_rest,
                         w_fc_p, b_fc_p, n_layers, time_chunk, unroll=None):
    T, B_pad, H_pad = xw0.shape
    O_pad = w_fc_p.shape[1]
    assert T % time_chunk == 0
    n_chunks = T // time_chunk
    if unroll is None:
        unroll = max(1, min(8, time_chunk))

    inputs = [xw0, whh0_bf]
    in_specs = [
        pl.BlockSpec((time_chunk, B_pad, H_pad), lambda i: (i, 0, 0)),  # streamed over T
        pl.BlockSpec((H_pad, H_pad), lambda i: (0, 0)),
    ]
    for l in range(n_layers - 1):
        inputs += [wih_rest_bf[l], whh_rest_bf[l], bias_rest[l]]
        in_specs += [pl.BlockSpec((H_pad, H_pad), lambda i: (0, 0)),
                     pl.BlockSpec((H_pad, H_pad), lambda i: (0, 0)),
                     pl.BlockSpec((1, H_pad), lambda i: (0, 0))]
    inputs += [w_fc_p, b_fc_p]
    in_specs += [pl.BlockSpec((H_pad, O_pad), lambda i: (0, 0)),
                 pl.BlockSpec((1, O_pad), lambda i: (0, 0))]

    out_specs = (pl.BlockSpec((B_pad, O_pad), lambda i: (0, 0)),
                 pl.BlockSpec((n_layers, B_pad, H_pad), lambda i: (0, 0, 0)))

    scratch = []
    if n_layers > 1:
        scratch.append(pltpu.VMEM((time_chunk, B_pad, H_pad), jnp.bfloat16))

    sig, hT = pl.pallas_call(
        _build_fused_kernel(n_layers, time_chunk, unroll),
        out_shape=(jax.ShapeDtypeStruct((B_pad, O_pad), jnp.float32),
                   jax.ShapeDtypeStruct((n_layers, B_pad, H_pad), jnp.float32)),
        grid=(n_chunks,),
        in_specs=in_specs,
        out_specs=out_specs,
        scratch_shapes=scratch,
        compiler_params=pltpu.CompilerParams(
            dimension_semantics=("arbitrary",),      # serial recurrence over time chunks
            vmem_limit_bytes=_vmem_limit_bytes(time_chunk, B_pad, H_pad, O_pad, n_layers)),
    )(*inputs)
    return sig, hT


# ------------------------------ Module port --------------------------------- #

class RNNSentimentPallas:
    """JAX/Pallas port of RNNSentiment with model_type=0 (nn.RNN), inference mode."""

    def __init__(self, model_type, vocab_size, embedding_dim, hidden_dim,
                 output_size, n_layers, key, drop_prob=0.5, time_chunk=64):
        assert model_type == 0, "this port implements the nn.RNN branch (model_type=0)"
        self.model_type = model_type
        self.vocab_size = vocab_size
        self.embedding_dim = embedding_dim
        self.hidden_dim = hidden_dim
        self.output_size = output_size
        self.n_layers = n_layers
        self.time_chunk = time_chunk
        # drop_prob only affects training-mode inter-layer dropout; inference = identity.

        self.H_pad = _round_up(hidden_dim, 128)
        self.O_pad = _round_up(output_size, 128)

        k = 1.0 / jnp.sqrt(jnp.float32(hidden_dim))
        keys = jax.random.split(key, 2 + 4 * n_layers + 2)
        ki = iter(keys)

        # Embedding table (stands in for the pickled w2v dict / nn.Embedding).
        self.embedding = jax.random.normal(next(ki), (vocab_size, embedding_dim),
                                           jnp.float32) * 0.1

        # Logical (unpadded) weights, stored transposed vs. PyTorch: (in, out).
        self.w_ih, self.w_hh, self.bias = [], [], []
        for layer in range(n_layers):
            din = embedding_dim if layer == 0 else hidden_dim
            w_ih = jax.random.uniform(next(ki), (din, hidden_dim), jnp.float32, -k, k)
            w_hh = jax.random.uniform(next(ki), (hidden_dim, hidden_dim), jnp.float32, -k, k)
            b_ih = jax.random.uniform(next(ki), (1, hidden_dim), jnp.float32, -k, k)
            b_hh = jax.random.uniform(next(ki), (1, hidden_dim), jnp.float32, -k, k)
            self.w_ih.append(w_ih)
            self.w_hh.append(w_hh)
            self.bias.append(b_ih + b_hh)

        self.w_fc = jax.random.uniform(next(ki), (hidden_dim, output_size),
                                       jnp.float32, -k, k)
        self.b_fc = jax.random.uniform(next(ki), (1, output_size), jnp.float32, -k, k)

        # Padded, kernel-facing weights. Matmul operands -> bf16 (MXU native); biases / FC f32.
        H, Hp, Op = hidden_dim, self.H_pad, self.O_pad
        self.w_ih0_p = _pad2(self.w_ih[0], embedding_dim, Hp)            # (E,Hp) f32: XLA einsum
        self.bias0_p = _pad2(self.bias[0], 1, Hp)                        # folded into xw0
        self.whh0_bf = _pad2(self.w_hh[0], Hp, Hp).astype(jnp.bfloat16)
        self.wih_rest_bf, self.whh_rest_bf, self.bias_rest_p = [], [], []
        for layer in range(1, n_layers):
            self.wih_rest_bf.append(_pad2(self.w_ih[layer], Hp, Hp).astype(jnp.bfloat16))
            self.whh_rest_bf.append(_pad2(self.w_hh[layer], Hp, Hp).astype(jnp.bfloat16))
            self.bias_rest_p.append(_pad2(self.bias[layer], 1, Hp))
        self.w_fc_p = _pad2(self.w_fc, Hp, Op)
        self.b_fc_p = _pad2(self.b_fc, 1, Op)

    def forward(self, input_words, hidden):
        """input_words: (B, T) int32 token ids. `hidden` is unused for model_type=0
        (matches the PyTorch forward, which ignores it for the RNN branch)."""
        del hidden
        B, T = input_words.shape
        # 16-row batch padding so bf16 (sublane-packed) tiles are exact on all generations.
        B_pad = _round_up(max(B, 16), 16)

        # Pick a time chunk that divides T (<= configured cap).
        tc = max(1, min(self.time_chunk, T))
        while T % tc != 0:
            tc -= 1

        embeds = jnp.take(self.embedding, input_words, axis=0).astype(jnp.float32)  # (B,T,E)
        embeds = jnp.pad(embeds, ((0, B_pad - B), (0, 0), (0, 0)))
        # Hoisted layer-0 projection as one MXU GEMM, produced directly time-major with the
        # bias folded in; cast to bf16 for the streamed kernel input.
        # NOTE: padded batch rows equal bias0 (nonzero) -> garbage rows, sliced off below.
        # TODO(synk): if the 'tbh' transposed writeback shows up in xprof at T=600/E=300,
        #             emit 'bth' and do the (b,t) reorder in the streaming index_map instead.
        xw0 = (jnp.einsum('bte,eh->tbh', embeds, self.w_ih0_p,
                          preferred_element_type=jnp.float32) + self.bias0_p)
        xw0 = xw0.astype(jnp.bfloat16)

        sig, hT = fused_rnn_fc_sigmoid(
            xw0, self.whh0_bf, self.wih_rest_bf, self.whh_rest_bf, self.bias_rest_p,
            self.w_fc_p, self.b_fc_p, self.n_layers, time_chunk=tc)

        sig = sig[:B, :self.output_size]                      # drop padding
        sig_out = sig[:, -1]                                  # == torch's sig_out[:, -1]
        new_hidden = hT[:, :B, :self.hidden_dim]              # (n_layers, B, H)
        return sig_out, new_hidden

    # Pure-JAX f32 reference (no Pallas) for correctness checking.
    def reference_forward(self, input_words):
        B, T = input_words.shape
        embeds = jnp.take(self.embedding, input_words, axis=0)
        x = jnp.transpose(embeds, (1, 0, 2)).astype(jnp.float32)
        h_finals = []
        for layer in range(self.n_layers):
            h = jnp.zeros((B, self.hidden_dim), jnp.float32)
            outs = []
            for t in range(T):
                h = jnp.tanh(x[t] @ self.w_ih[layer] + h @ self.w_hh[layer]
                             + self.bias[layer])
                outs.append(h)
            x = jnp.stack(outs, axis=0)
            h_finals.append(h)
        logits = x[T - 1] @ self.w_fc + self.b_fc
        sig = 1.0 / (1.0 + jnp.exp(-logits))
        return sig[:, -1], jnp.stack(h_finals, axis=0)


# --------------------------------- Main ------------------------------------- #

if __name__ == "__main__":
    B, T = 4, 16                # small stand-ins for the hardcoded (25, 600)
    vocab_size = 50
    embedding_dim = 16          # stand-in for 300
    hidden_dim = 32
    output_size = 1
    n_layers = 2

    key = jax.random.PRNGKey(0)
    model = RNNSentimentPallas(model_type=0, vocab_size=vocab_size,
                               embedding_dim=embedding_dim, hidden_dim=hidden_dim,
                               output_size=output_size, n_layers=n_layers, key=key,
                               time_chunk=4)   # 4 chunks -> exercises the streamed grid + carry

    input_words = jax.random.randint(jax.random.fold_in(key, 123), (B, T), 0,
                                     vocab_size, dtype=jnp.int32)
    hidden0 = jnp.zeros((n_layers, B, hidden_dim), jnp.float32)

    sig_out, hidden = model.forward(input_words, hidden0)
    sig_out = jax.block_until_ready(sig_out)
    hidden = jax.block_until_ready(hidden)

    ref_sig, ref_hidden = model.reference_forward(input_words)
    assert sig_out.shape == (B,)
    assert hidden.shape == (n_layers, B, hidden_dim)
    # bf16 MXU operands in the kernel vs. pure-f32 reference -> loosened tolerance.
    assert jnp.allclose(sig_out, ref_sig, atol=2e-2, rtol=2e-2), \
        float(jnp.max(jnp.abs(sig_out - ref_sig)))
    assert jnp.allclose(hidden, ref_hidden, atol=2e-2, rtol=2e-2), \
        float(jnp.max(jnp.abs(hidden - ref_hidden)))

    print("KERNEL_OK")
</pallas_src>

<mosaic_0001>
module attributes {stable_mosaic.version = 11 : i64} {
  func.func @kernel(%arg0: i32, %arg1: memref<4x16x128xbf16, #tpu.memory_space<vmem>>, %arg2: memref<128x128xbf16, #tpu.memory_space<vmem>>, %arg3: memref<128x128xbf16, #tpu.memory_space<vmem>>, %arg4: memref<128x128xbf16, #tpu.memory_space<vmem>>, %arg5: memref<1x128xf32, #tpu.memory_space<vmem>>, %arg6: memref<128x128xf32, #tpu.memory_space<vmem>>, %arg7: memref<1x128xf32, #tpu.memory_space<vmem>>, %arg8: memref<16x128xf32, #tpu.memory_space<vmem>>, %arg9: memref<2x16x128xf32, #tpu.memory_space<vmem>>, %arg10: memref<4x16x128xbf16, #tpu.memory_space<vmem>>) attributes {dimension_semantics = [#tpu.dimension_semantics<arbitrary>], iteration_bounds = array<i64: 4>, scalar_prefetch = 0 : i64, scratch_operands = 1 : i64, tpu.core_type = #tpu.core_type<tc>, window_params = [{transform_indices = @transform_0, window_bounds = array<i64: 4, 16, 128>}, {pipeline_mode = #tpu.pipeline_mode<synchronous>, transform_indices = @transform_1, window_bounds = array<i64: 128, 128>}, {pipeline_mode = #tpu.pipeline_mode<synchronous>, transform_indices = @transform_2, window_bounds = array<i64: 128, 128>}, {pipeline_mode = #tpu.pipeline_mode<synchronous>, transform_indices = @transform_3, window_bounds = array<i64: 128, 128>}, {pipeline_mode = #tpu.pipeline_mode<synchronous>, transform_indices = @transform_4, window_bounds = array<i64: 1, 128>}, {pipeline_mode = #tpu.pipeline_mode<synchronous>, transform_indices = @transform_5, window_bounds = array<i64: 128, 128>}, {pipeline_mode = #tpu.pipeline_mode<synchronous>, transform_indices = @transform_6, window_bounds = array<i64: 1, 128>}, {pipeline_mode = #tpu.pipeline_mode<synchronous>, transform_indices = @transform_7, window_bounds = array<i64: 16, 128>}, {pipeline_mode = #tpu.pipeline_mode<synchronous>, transform_indices = @transform_8, window_bounds = array<i64: 2, 16, 128>}]} {
    %c0_i32 = arith.constant 0 : i32
    %0 = arith.cmpi eq, %arg0, %c0_i32 : i32
    %1 = arith.extui %0 : i1 to i32
    %c0_i32_0 = arith.constant 0 : i32
    %2 = arith.cmpi ne, %1, %c0_i32_0 : i32
    scf.if %2 {
      %cst_65 = arith.constant 0.000000e+00 : f32
      %112 = vector.broadcast %cst_65 : f32 to vector<2x16x128xf32>
      %c0_66 = arith.constant 0 : index
      %c0_67 = arith.constant 0 : index
      %c0_68 = arith.constant 0 : index
      %113 = vector.load %arg9[%c0_66, %c0_67, %c0_68] : memref<2x16x128xf32, #tpu.memory_space<vmem>>, vector<2x16x128xf32>
      tpu.vector_store %arg9[%c0_66, %c0_67, %c0_68], %112 {strides = array<i32>} : memref<2x16x128xf32, #tpu.memory_space<vmem>>, vector<2x16x128xf32>,
    } else {
    }
    %c0 = arith.constant 0 : index
    %c0_1 = arith.constant 0 : index
    %3 = vector.load %arg2[%c0, %c0_1] : memref<128x128xbf16, #tpu.memory_space<vmem>>, vector<128x128xbf16>
    %c0_2 = arith.constant 0 : index
    %c0_3 = arith.constant 0 : index
    %c0_4 = arith.constant 0 : index
    %4 = vector.load %arg9[%c0_2, %c0_3, %c0_4] : memref<2x16x128xf32, #tpu.memory_space<vmem>>, vector<1x16x128xf32>
    %5 = vector.shape_cast %4 : vector<1x16x128xf32> to vector<16x128xf32>
    %c0_i32_5 = arith.constant 0 : i32
    %6 = arith.index_cast %c0_i32_5 : i32 to index
    %c0_6 = arith.constant 0 : index
    %c0_7 = arith.constant 0 : index
    %7 = vector.load %arg1[%6, %c0_6, %c0_7] : memref<4x16x128xbf16, #tpu.memory_space<vmem>>, vector<1x16x128xbf16>
    %8 = vector.shape_cast %7 : vector<1x16x128xbf16> to vector<16x128xbf16>
    %9 = arith.extf %8 : vector<16x128xbf16> to vector<16x128xf32>
    %10 = arith.truncf %5 : vector<16x128xf32> to vector<16x128xbf16>
    %cst = arith.constant dense<0.000000e+00> : vector<16x128xf32>
    %11 = tpu.matmul %10, %3, %cst {dimension_numbers = #tpu.dot_dimension_numbers<[1], [0], [0], [1], [0, 0, 1, 1], [], []>} : vector<16x128xbf16>, vector<128x128xbf16>, vector<16x128xf32> -> vector<16x128xf32>
    %12 = arith.addf %9, %11 : vector<16x128xf32>
    %13 = math.tanh %12 : vector<16x128xf32>
    %14 = arith.truncf %13 : vector<16x128xf32> to vector<16x128xbf16>
    %15 = arith.index_cast %c0_i32_5 : i32 to index
    %c0_8 = arith.constant 0 : index
    %c0_9 = arith.constant 0 : index
    %16 = vector.load %arg10[%15, %c0_8, %c0_9] : memref<4x16x128xbf16, #tpu.memory_space<vmem>>, vector<1x16x128xbf16>
    %17 = vector.shape_cast %16 : vector<1x16x128xbf16> to vector<16x128xbf16>
    %18 = vector.shape_cast %14 : vector<16x128xbf16> to vector<1x16x128xbf16>
    tpu.vector_store %arg10[%15, %c0_8, %c0_9], %18 {strides = array<i32>} : memref<4x16x128xbf16, #tpu.memory_space<vmem>>, vector<1x16x128xbf16>,
    %c1_i32 = arith.constant 1 : i32
    %19 = arith.index_cast %c1_i32 : i32 to index
    %c0_10 = arith.constant 0 : index
    %c0_11 = arith.constant 0 : index
    %20 = vector.load %arg1[%19, %c0_10, %c0_11] : memref<4x16x128xbf16, #tpu.memory_space<vmem>>, vector<1x16x128xbf16>
    %21 = vector.shape_cast %20 : vector<1x16x128xbf16> to vector<16x128xbf16>
    %22 = arith.extf %21 : vector<16x128xbf16> to vector<16x128xf32>
    %23 = arith.truncf %13 : vector<16x128xf32> to vector<16x128xbf16>
    %cst_12 = arith.constant dense<0.000000e+00> : vector<16x128xf32>
    %24 = tpu.matmul %23, %3, %cst_12 {dimension_numbers = #tpu.dot_dimension_numbers<[1], [0], [0], [1], [0, 0, 1, 1], [], []>} : vector<16x128xbf16>, vector<128x128xbf16>, vector<16x128xf32> -> vector<16x128xf32>
    %25 = arith.addf %22, %24 : vector<16x128xf32>
    %26 = math.tanh %25 : vector<16x128xf32>
    %27 = arith.truncf %26 : vector<16x128xf32> to vector<16x128xbf16>
    %28 = arith.index_cast %c1_i32 : i32 to index
    %c0_13 = arith.constant 0 : index
    %c0_14 = arith.constant 0 : index
    %29 = vector.load %arg10[%28, %c0_13, %c0_14] : memref<4x16x128xbf16, #tpu.memory_space<vmem>>, vector<1x16x128xbf16>
    %30 = vector.shape_cast %29 : vector<1x16x128xbf16> to vector<16x128xbf16>
    %31 = vector.shape_cast %27 : vector<16x128xbf16> to vector<1x16x128xbf16>
    tpu.vector_store %arg10[%28, %c0_13, %c0_14], %31 {strides = array<i32>} : memref<4x16x128xbf16, #tpu.memory_space<vmem>>, vector<1x16x128xbf16>,
    %c2_i32 = arith.constant 2 : i32
    %32 = arith.index_cast %c2_i32 : i32 to index
    %c0_15 = arith.constant 0 : index
    %c0_16 = arith.constant 0 : index
    %33 = vector.load %arg1[%32, %c0_15, %c0_16] : memref<4x16x128xbf16, #tpu.memory_space<vmem>>, vector<1x16x128xbf16>
    %34 = vector.shape_cast %33 : vector<1x16x128xbf16> to vector<16x128xbf16>
    %35 = arith.extf %34 : vector<16x128xbf16> to vector<16x128xf32>
    %36 = arith.truncf %26 : vector<16x128xf32> to vector<16x128xbf16>
    %cst_17 = arith.constant dense<0.000000e+00> : vector<16x128xf32>
    %37 = tpu.matmul %36, %3, %cst_17 {dimension_numbers = #tpu.dot_dimension_numbers<[1], [0], [0], [1], [0, 0, 1, 1], [], []>} : vector<16x128xbf16>, vector<128x128xbf16>, vector<16x128xf32> -> vector<16x128xf32>
    %38 = arith.addf %35, %37 : vector<16x128xf32>
    %39 = math.tanh %38 : vector<16x128xf32>
    %40 = arith.truncf %39 : vector<16x128xf32> to vector<16x128xbf16>
    %41 = arith.index_cast %c2_i32 : i32 to index
    %c0_18 = arith.constant 0 : index
    %c0_19 = arith.constant 0 : index
    %42 = vector.load %arg10[%41, %c0_18, %c0_19] : memref<4x16x128xbf16, #tpu.memory_space<vmem>>, vector<1x16x128xbf16>
    %43 = vector.shape_cast %42 : vector<1x16x128xbf16> to vector<16x128xbf16>
    %44 = vector.shape_cast %40 : vector<16x128xbf16> to vector<1x16x128xbf16>
    tpu.vector_store %arg10[%41, %c0_18, %c0_19], %44 {strides = array<i32>} : memref<4x16x128xbf16, #tpu.memory_space<vmem>>, vector<1x16x128xbf16>,
    %c3_i32 = arith.constant 3 : i32
    %45 = arith.index_cast %c3_i32 : i32 to index
    %c0_20 = arith.constant 0 : index
    %c0_21 = arith.constant 0 : index
    %46 = vector.load %arg1[%45, %c0_20, %c0_21] : memref<4x16x128xbf16, #tpu.memory_space<vmem>>, vector<1x16x128xbf16>
    %47 = vector.shape_cast %46 : vector<1x16x128xbf16> to vector<16x128xbf16>
    %48 = arith.extf %47 : vector<16x128xbf16> to vector<16x128xf32>
    %49 = arith.truncf %39 : vector<16x128xf32> to vector<16x128xbf16>
    %cst_22 = arith.constant dense<0.000000e+00> : vector<16x128xf32>
    %50 = tpu.matmul %49, %3, %cst_22 {dimension_numbers = #tpu.dot_dimension_numbers<[1], [0], [0], [1], [0, 0, 1, 1], [], []>} : vector<16x128xbf16>, vector<128x128xbf16>, vector<16x128xf32> -> vector<16x128xf32>
    %51 = arith.addf %48, %50 : vector<16x128xf32>
    %52 = math.tanh %51 : vector<16x128xf32>
    %53 = arith.truncf %52 : vector<16x128xf32> to vector<16x128xbf16>
    %54 = arith.index_cast %c3_i32 : i32 to index
    %c0_23 = arith.constant 0 : index
    %c0_24 = arith.constant 0 : index
    %55 = vector.load %arg10[%54, %c0_23, %c0_24] : memref<4x16x128xbf16, #tpu.memory_space<vmem>>, vector<1x16x128xbf16>
    %56 = vector.shape_cast %55 : vector<1x16x128xbf16> to vector<16x128xbf16>
    %57 = vector.shape_cast %53 : vector<16x128xbf16> to vector<1x16x128xbf16>
    tpu.vector_store %arg10[%54, %c0_23, %c0_24], %57 {strides = array<i32>} : memref<4x16x128xbf16, #tpu.memory_space<vmem>>, vector<1x16x128xbf16>,
    %c4_i32 = arith.constant 4 : i32
    %c0_25 = arith.constant 0 : index
    %c0_26 = arith.constant 0 : index
    %c0_27 = arith.constant 0 : index
    %58 = vector.load %arg9[%c0_25, %c0_26, %c0_27] : memref<2x16x128xf32, #tpu.memory_space<vmem>>, vector<1x16x128xf32>
    %59 = vector.shape_cast %58 : vector<1x16x128xf32> to vector<16x128xf32>
    %60 = vector.shape_cast %52 : vector<16x128xf32> to vector<1x16x128xf32>
    tpu.vector_store %arg9[%c0_25, %c0_26, %c0_27], %60 {strides = array<i32>} : memref<2x16x128xf32, #tpu.memory_space<vmem>>, vector<1x16x128xf32>,
    %c0_28 = arith.constant 0 : index
    %c0_29 = arith.constant 0 : index
    %c0_30 = arith.constant 0 : index
    %61 = vector.load %arg10[%c0_28, %c0_29, %c0_30] : memref<4x16x128xbf16, #tpu.memory_space<vmem>>, vector<4x16x128xbf16>
    %62 = vector.shape_cast %61 : vector<4x16x128xbf16> to vector<64x128xbf16>
    %c0_31 = arith.constant 0 : index
    %c0_32 = arith.constant 0 : index
    %63 = vector.load %arg3[%c0_31, %c0_32] : memref<128x128xbf16, #tpu.memory_space<vmem>>, vector<128x128xbf16>
    %cst_33 = arith.constant dense<0.000000e+00> : vector<64x128xf32>
    %64 = tpu.matmul %62, %63, %cst_33 {dimension_numbers = #tpu.dot_dimension_numbers<[1], [0], [0], [1], [0, 0, 1, 1], [], []>} : vector<64x128xbf16>, vector<128x128xbf16>, vector<64x128xf32> -> vector<64x128xf32>
    %c0_34 = arith.constant 0 : index
    %c0_35 = arith.constant 0 : index
    %65 = vector.load %arg5[%c0_34, %c0_35] : memref<1x128xf32, #tpu.memory_space<vmem>>, vector<1x128xf32>
    %66 = vector.broadcast %65 : vector<1x128xf32> to vector<64x128xf32>
    %67 = arith.addf %64, %66 : vector<64x128xf32>
    %68 = vector.shape_cast %67 : vector<64x128xf32> to vector<4x16x128xf32>
    %69 = arith.truncf %68 : vector<4x16x128xf32> to vector<4x16x128xbf16>
    %c0_36 = arith.constant 0 : index
    %c0_37 = arith.constant 0 : index
    %c0_38 = arith.constant 0 : index
    %70 = vector.load %arg10[%c0_36, %c0_37, %c0_38] : memref<4x16x128xbf16, #tpu.memory_space<vmem>>, vector<4x16x128xbf16>
    tpu.vector_store %arg10[%c0_36, %c0_37, %c0_38], %69 {strides = array<i32>} : memref<4x16x128xbf16, #tpu.memory_space<vmem>>, vector<4x16x128xbf16>,
    %c0_39 = arith.constant 0 : index
    %c0_40 = arith.constant 0 : index
    %71 = vector.load %arg4[%c0_39, %c0_40] : memref<128x128xbf16, #tpu.memory_space<vmem>>, vector<128x128xbf16>
    %c1 = arith.constant 1 : index
    %c0_41 = arith.constant 0 : index
    %c0_42 = arith.constant 0 : index
    %72 = vector.load %arg9[%c1, %c0_41, %c0_42] : memref<2x16x128xf32, #tpu.memory_space<vmem>>, vector<1x16x128xf32>
    %73 = vector.shape_cast %72 : vector<1x16x128xf32> to vector<16x128xf32>
    %c0_i32_43 = arith.constant 0 : i32
    %74 = arith.index_cast %c0_i32_43 : i32 to index
    %c0_44 = arith.constant 0 : index
    %c0_45 = arith.constant 0 : index
    %75 = vector.load %arg10[%74, %c0_44, %c0_45] : memref<4x16x128xbf16, #tpu.memory_space<vmem>>, vector<1x16x128xbf16>
    %76 = vector.shape_cast %75 : vector<1x16x128xbf16> to vector<16x128xbf16>
    %77 = arith.extf %76 : vector<16x128xbf16> to vector<16x128xf32>
    %78 = arith.truncf %73 : vector<16x128xf32> to vector<16x128xbf16>
    %cst_46 = arith.constant dense<0.000000e+00> : vector<16x128xf32>
    %79 = tpu.matmul %78, %71, %cst_46 {dimension_numbers = #tpu.dot_dimension_numbers<[1], [0], [0], [1], [0, 0, 1, 1], [], []>} : vector<16x128xbf16>, vector<128x128xbf16>, vector<16x128xf32> -> vector<16x128xf32>
    %80 = arith.addf %77, %79 : vector<16x128xf32>
    %81 = math.tanh %80 : vector<16x128xf32>
    %c1_i32_47 = arith.constant 1 : i32
    %82 = arith.index_cast %c1_i32_47 : i32 to index
    %c0_48 = arith.constant 0 : index
    %c0_49 = arith.constant 0 : index
    %83 = vector.load %arg10[%82, %c0_48, %c0_49] : memref<4x16x128xbf16, #tpu.memory_space<vmem>>, vector<1x16x128xbf16>
    %84 = vector.shape_cast %83 : vector<1x16x128xbf16> to vector<16x128xbf16>
    %85 = arith.extf %84 : vector<16x128xbf16> to vector<16x128xf32>
    %86 = arith.truncf %81 : vector<16x128xf32> to vector<16x128xbf16>
    %cst_50 = arith.constant dense<0.000000e+00> : vector<16x128xf32>
    %87 = tpu.matmul %86, %71, %cst_50 {dimension_numbers = #tpu.dot_dimension_numbers<[1], [0], [0], [1], [0, 0, 1, 1], [], []>} : vector<16x128xbf16>, vector<128x128xbf16>, vector<16x128xf32> -> vector<16x128xf32>
    %88 = arith.addf %85, %87 : vector<16x128xf32>
    %89 = math.tanh %88 : vector<16x128xf32>
    %c2_i32_51 = arith.constant 2 : i32
    %90 = arith.index_cast %c2_i32_51 : i32 to index
    %c0_52 = arith.constant 0 : index
    %c0_53 = arith.constant 0 : index
    %91 = vector.load %arg10[%90, %c0_52, %c0_53] : memref<4x16x128xbf16, #tpu.memory_space<vmem>>, vector<1x16x128xbf16>
    %92 = vector.shape_cast %91 : vector<1x16x128xbf16> to vector<16x128xbf16>
    %93 = arith.extf %92 : vector<16x128xbf16> to vector<16x128xf32>
    %94 = arith.truncf %89 : vector<16x128xf32> to vector<16x128xbf16>
    %cst_54 = arith.constant dense<0.000000e+00> : vector<16x128xf32>
    %95 = tpu.matmul %94, %71, %cst_54 {dimension_numbers = #tpu.dot_dimension_numbers<[1], [0], [0], [1], [0, 0, 1, 1], [], []>} : vector<16x128xbf16>, vector<128x128xbf16>, vector<16x128xf32> -> vector<16x128xf32>
    %96 = arith.addf %93, %95 : vector<16x128xf32>
    %97 = math.tanh %96 : vector<16x128xf32>
    %c3_i32_55 = arith.constant 3 : i32
    %98 = arith.index_cast %c3_i32_55 : i32 to index
    %c0_56 = arith.constant 0 : index
    %c0_57 = arith.constant 0 : index
    %99 = vector.load %arg10[%98, %c0_56, %c0_57] : memref<4x16x128xbf16, #tpu.memory_space<vmem>>, vector<1x16x128xbf16>
    %100 = vector.shape_cast %99 : vector<1x16x128xbf16> to vector<16x128xbf16>
    %101 = arith.extf %100 : vector<16x128xbf16> to vector<16x128xf32>
    %102 = arith.truncf %97 : vector<16x128xf32> to vector<16x128xbf16>
    %cst_58 = arith.constant dense<0.000000e+00> : vector<16x128xf32>
    %103 = tpu.matmul %102, %71, %cst_58 {dimension_numbers = #tpu.dot_dimension_numbers<[1], [0], [0], [1], [0, 0, 1, 1], [], []>} : vector<16x128xbf16>, vector<128x128xbf16>, vector<16x128xf32> -> vector<16x128xf32>
    %104 = arith.addf %101, %103 : vector<16x128xf32>
    %105 = math.tanh %104 : vector<16x128xf32>
    %c4_i32_59 = arith.constant 4 : i32
    %c1_60 = arith.constant 1 : index
    %c0_61 = arith.constant 0 : index
    %c0_62 = arith.constant 0 : index
    %106 = vector.load %arg9[%c1_60, %c0_61, %c0_62] : memref<2x16x128xf32, #tpu.memory_space<vmem>>, vector<1x16x128xf32>
    %107 = vector.shape_cast %106 : vector<1x16x128xf32> to vector<16x128xf32>
    %108 = vector.shape_cast %105 : vector<16x128xf32> to vector<1x16x128xf32>
    tpu.vector_store %arg9[%c1_60, %c0_61, %c0_62], %108 {strides = array<i32>} : memref<2x16x128xf32, #tpu.memory_space<vmem>>, vector<1x16x128xf32>,
    %c3_i32_63 = arith.constant 3 : i32
    %109 = arith.cmpi eq, %arg0, %c3_i32_63 : i32
    %110 = arith.extui %109 : i1 to i32
    %c0_i32_64 = arith.constant 0 : i32
    %111 = arith.cmpi ne, %110, %c0_i32_64 : i32
    scf.if %111 {
      %c1_65 = arith.constant 1 : index
      %c0_66 = arith.constant 0 : index
      %c0_67 = arith.constant 0 : index
      %112 = vector.load %arg9[%c1_65, %c0_66, %c0_67] : memref<2x16x128xf32, #tpu.memory_space<vmem>>, vector<1x16x128xf32>
      %113 = vector.shape_cast %112 : vector<1x16x128xf32> to vector<16x128xf32>
      %c0_68 = arith.constant 0 : index
      %c0_69 = arith.constant 0 : index
      %114 = vector.load %arg6[%c0_68, %c0_69] : memref<128x128xf32, #tpu.memory_space<vmem>>, vector<128x128xf32>
      %cst_70 = arith.constant dense<0.000000e+00> : vector<16x128xf32>
      %115 = tpu.matmul %113, %114, %cst_70 {dimension_numbers = #tpu.dot_dimension_numbers<[1], [0], [0], [1], [0, 0, 1, 1], [], []>} : vector<16x128xf32>, vector<128x128xf32>, vector<16x128xf32> -> vector<16x128xf32>
      %c0_71 = arith.constant 0 : index
      %c0_72 = arith.constant 0 : index
      %116 = vector.load %arg7[%c0_71, %c0_72] : memref<1x128xf32, #tpu.memory_space<vmem>>, vector<1x128xf32>
      %117 = vector.broadcast %116 : vector<1x128xf32> to vector<16x128xf32>
      %118 = arith.addf %115, %117 : vector<16x128xf32>
      %cst_73 = arith.constant 0.000000e+00 : f32
      %119 = vector.broadcast %cst_73 : f32 to vector<16x128xf32>
      %120 = arith.subf %119, %118 : vector<16x128xf32>
      %121 = math.exp %120 : vector<16x128xf32>
      %cst_74 = arith.constant 1.000000e+00 : f32
      %122 = vector.broadcast %cst_74 : f32 to vector<16x128xf32>
      %123 = arith.addf %122, %121 : vector<16x128xf32>
      %cst_75 = arith.constant 1.000000e+00 : f32
      %124 = vector.broadcast %cst_75 : f32 to vector<16x128xf32>
      %125 = arith.divf %124, %123 : vector<16x128xf32>
      %c0_76 = arith.constant 0 : index
      %c0_77 = arith.constant 0 : index
      %126 = vector.load %arg8[%c0_76, %c0_77] : memref<16x128xf32, #tpu.memory_space<vmem>>, vector<16x128xf32>
      tpu.vector_store %arg8[%c0_76, %c0_77], %125 {strides = array<i32>} : memref<16x128xf32, #tpu.memory_space<vmem>>, vector<16x128xf32>,
    } else {
    }
    return
  }
  func.func @transform_0(%arg0: i32) -> (i32, i32, i32) {
    %c0_i32 = arith.constant 0 : i32
    %c0_i32_0 = arith.constant 0 : i32
    %c0_i32_1 = arith.constant 0 : i32
    return %arg0, %c0_i32, %c0_i32_0 : i32, i32, i32
  }
  func.func @transform_1(%arg0: i32) -> (i32, i32) {
    %c0_i32 = arith.constant 0 : i32
    %c0_i32_0 = arith.constant 0 : i32
    %c0_i32_1 = arith.constant 0 : i32
    return %c0_i32, %c0_i32_0 : i32, i32
  }
  func.func @transform_2(%arg0: i32) -> (i32, i32) {
    %c0_i32 = arith.constant 0 : i32
    %c0_i32_0 = arith.constant 0 : i32
    %c0_i32_1 = arith.constant 0 : i32
    return %c0_i32, %c0_i32_0 : i32, i32
  }
  func.func @transform_3(%arg0: i32) -> (i32, i32) {
    %c0_i32 = arith.constant 0 : i32
    %c0_i32_0 = arith.constant 0 : i32
    %c0_i32_1 = arith.constant 0 : i32
    return %c0_i32, %c0_i32_0 : i32, i32
  }
  func.func @transform_4(%arg0: i32) -> (i32, i32) {
    %c0_i32 = arith.constant 0 : i32
    %c0_i32_0 = arith.constant 0 : i32
    %c0_i32_1 = arith.constant 0 : i32
    return %c0_i32, %c0_i32_0 : i32, i32
  }
  func.func @transform_5(%arg0: i32) -> (i32, i32) {
    %c0_i32 = arith.constant 0 : i32
    %c0_i32_0 = arith.constant 0 : i32
    %c0_i32_1 = arith.constant 0 : i32
    return %c0_i32, %c0_i32_0 : i32, i32
  }
  func.func @transform_6(%arg0: i32) -> (i32, i32) {
    %c0_i32 = arith.constant 0 : i32
    %c0_i32_0 = arith.constant 0 : i32
    %c0_i32_1 = arith.constant 0 : i32
    return %c0_i32, %c0_i32_0 : i32, i32
  }
  func.func @transform_7(%arg0: i32) -> (i32, i32) {
    %c0_i32 = arith.constant 0 : i32
    %c0_i32_0 = arith.constant 0 : i32
    %c0_i32_1 = arith.constant 0 : i32
    return %c0_i32, %c0_i32_0 : i32, i32
  }
  func.func @transform_8(%arg0: i32) -> (i32, i32, i32) {
    %c0_i32 = arith.constant 0 : i32
    %c0_i32_0 = arith.constant 0 : i32
    %c0_i32_1 = arith.constant 0 : i32
    %c0_i32_2 = arith.constant 0 : i32
    return %c0_i32, %c0_i32_0, %c0_i32_1 : i32, i32, i32
  }
}

</mosaic_0001>

<bundles_post_ra>
// kernel: tpu_custom_call.1
= control target key start
LH: loop header
LB: loop body
LE: loop exit
PB: predicated region body
PF: predicated region fallthrough
CT: control target
= control target key end

     0   :  { %14 = vsyncpa [#allocation4], 0  ;;  %s2687_s0 = inlined_call_operand.hbm [shape: bf16[16,16,128], index: 0, kind: input, shape index: {}]   ;;  %s2688_s1 = inlined_call_operand.hbm [shape: bf16[128,128], index: 1, kind: input, shape index: {}]   ;;  %s2689_s2 = inlined_call_operand.hbm [shape: bf16[128,128], index: 2, kind: input, shape index: {}]   ;;  %s2690_s3 = inlined_call_operand.hbm [shape: bf16[128,128], index: 3, kind: input, shape index: {}]   ;;  %s2691_s4 = inlined_call_operand.vmem [shape: f32[1,128], index: 4, kind: input, shape index: {}]   ;;  %s2692_s5 = inlined_call_operand.hbm [shape: f32[128,128], index: 5, kind: input, shape index: {}]   ;;  %s2693_s6 = inlined_call_operand.vmem [shape: f32[1,128], index: 6, kind: input, shape index: {}]   ;;  %s2694_s7 = inlined_call_operand.hbm [shape: f32[16,128], index: 7, kind: output, shape index: {0}]   ;;  %s2695_s8 = inlined_call_operand.hbm [shape: f32[2,16,128], index: 8, kind: output, shape index: {1}]  }
   0x1   :  { %16 = vsyncpa [#allocation4 + $0x1], 0 }
   0x2   :  { %17 = vsyncpa [#allocation7], 0 }
   0x3   :  { %18 = vsyncpa [#allocation10], 0 }
   0x4   :  { %19 = vsyncpa [#allocation5], 0 }
   0x5   :  { %20 = vsyncpa [#allocation14], 0  ;;  %s2216_s27 = smov 0   ;;  %s2218_s28 = smov 0  }
   0x6   :  { %s2220_s29 = smov 0   ;;  %s2222_s30 = smov 0  }
   0x7 LB: > { %s2235_s9 = sadd.s32 4294967295, %s2153_s30   ;;  %p46_p0 = scmp.ne.s32.totalorder %s2145_s28, %s2141_s27  ;;  %s2153_s30 = sphi %s2222_s30, %s2714_s30   ;;  %s2149_s29 = sphi %s2220_s29, %s2713_s29   ;;  %s2145_s28 = sphi %s2218_s28, %s2712_s28   ;;  %s2141_s27 = sphi %s2216_s27, %s2711_s27  }
   0x8   : > { %p2696_p1 = scmp.eq.s32.totalorder %s2235_s9, 0  ;;  %p1312_p2 = scmp.ge.s32.totalorder %s2153_s30, 1 }
   0x9   : > { %p225_p3 = scmp.lt.s32.totalorder %s2153_s30, 5  ;;  %s2155_s12 = smov [#allocation6]  }
   0xa   : > { %p2244_p5 = por %p2696_p1, %p46_p0  ;;  %s237_s13 = sshll.u32 %s2155_s12, 4  ;;  %s2252_s13 = int_to_ptr.vmem [resolvable:$true] %s237_s13 }
   0xb   : > { %p2248_p6 = pnand %p1312_p2, %p225_p3  ;;  %s2156_s15 = smov [#allocation9]  }
   0xc   : > { %s2699_s10 = scalar_select %p2244_p5, 1, 0 }
   0xd   : > { %s2700_s11 = scalar_select %p2248_p6, 1, 0 }
   0xe   : > { %p1768_p7 = pneg %p2248_p6  ;;  %s263_s16 = sshll.u32 %s2156_s15, 4  ;;  %s2262_s16 = int_to_ptr.vmem [resolvable:$true] %s263_s16 }
   0xf   : > { %s2157_s17 = smov [#allocation8]   ;;  %s1909_s21 = scalar_lea.hbm %s2688_s1, 1024 }
  0x10   : > { %p2258_p8 = pnand %p1768_p7, %p2696_p1  ;;  %s2264_s18 = sshll.u32 %s2157_s17, 4  ;;  %s251_s18 = int_to_ptr.vmem [resolvable:$true] %s2264_s18 }
  0x11   : > { %p1910_p9 = scmp.ne.s32.totalorder %s2688_s1, %s1909_s21  ;;  %p1916_p13 = scmp.lt.u32.totalorder %s1909_s21, %s2688_s1 }
  0x12   : > { %p2274_p10 = pneg %p2258_p8 }
  0x14   : > { %p1912_p11 = pnand %p2274_p10, %p1910_p9 }
  0x16   : > { %p1913_p12 = pneg %p1912_p11 }
  0x18   : > { %p1918_p0 = pnand %p1916_p13, %p1913_p12 }
  0x1a   : > { %1921 = shalt.err (!%p1918_p0)
}
  0x1b   : > { %s1922_s27 = scalar_lea.vmem %s2252_s13, 1024  ;;  %p1930_p4 = scmp.lt.s32.totalorder %s2252_s13, %s2252_s13 }
  0x1c   : > { %p1923_p2 = scmp.ne.s32.totalorder %s2252_s13, %s1922_s27  ;;  %p1931_p1 = scmp.lt.s32.totalorder %s1922_s27, %s1922_s27 }
  0x1e   : > { %p1925_p3 = pnand %p1923_p2, %p2274_p10  ;;  %p1932_p9 = por %p1931_p1, %p1930_p4 }
  0x20   : > { %p1926_p7 = pneg %p1925_p3 }
  0x22   : > { %p1933_p11 = pnand %p1932_p9, %p1926_p7 }
  0x24   : > { %1936 = shalt.err (!%p1933_p11)
}
  0x25   : > { %s2158_s12 = smov 64   ;;  %s2159_s15 = smov 4  }
  0x26   : > { %1771 = dma.hbm_to_vmem [thread:$0]  (!%p2258_p8), %s2688_s1, 1024, %s2252_s13, [#allocation7], %s2158_s12, %s2158_s12, %s2159_s15  }
  0x27   : > { %s1937_s22 = scalar_lea.hbm %s2690_s3, 1024 }
  0x28   : > { %p1938_p1 = scmp.ne.s32.totalorder %s2690_s3, %s1937_s22  ;;  %p1944_p13 = scmp.lt.u32.totalorder %s1937_s22, %s2690_s3 }
  0x2a   : > { %p1940_p4 = pnand %p1938_p1, %p2274_p10 }
  0x2c   : > { %p1941_p12 = pneg %p1940_p4 }
  0x2e   : > { %p1946_p0 = pnand %p1944_p13, %p1941_p12 }
  0x30   : > { %1949 = shalt.err (!%p1946_p0)
}
  0x31   : > { %s1950_s13 = scalar_lea.vmem %s2262_s16, 1024  ;;  %p1958_p9 = scmp.lt.s32.totalorder %s2262_s16, %s2262_s16 }
  0x32   : > { %p1951_p2 = scmp.ne.s32.totalorder %s2262_s16, %s1950_s13  ;;  %p1959_p11 = scmp.lt.s32.totalorder %s1950_s13, %s1950_s13 }
  0x34   : > { %p1953_p3 = pnand %p1951_p2, %p2274_p10  ;;  %p1960_p1 = por %p1959_p11, %p1958_p9 }
  0x36   : > { %p1954_p7 = pneg %p1953_p3 }
  0x38   : > { %p1961_p4 = pnand %p1960_p1, %p1954_p7 }
  0x3a   : > { %1964 = shalt.err (!%p1961_p4)
}
  0x3b   : > { %1777 = dma.hbm_to_vmem [thread:$0]  (!%p2258_p8), %s2690_s3, 1024, %s2262_s16, [#allocation10], %s2158_s12, %s2158_s12, %s2159_s15  }
  0x3c   : > { %s1965_s22 = scalar_lea.hbm %s2689_s2, 1024 }
  0x3d   : > { %p1966_p12 = scmp.ne.s32.totalorder %s2689_s2, %s1965_s22  ;;  %p1972_p2 = scmp.lt.u32.totalorder %s1965_s22, %s2689_s2 }
  0x3f   : > { %p1968_p13 = pnand %p1966_p12, %p2274_p10 }
  0x41   : > { %p1969_p0 = pneg %p1968_p13 }
  0x43   : > { %p1974_p3 = pnand %p1972_p2, %p1969_p0 }
  0x45   : > { %1977 = shalt.err (!%p1974_p3)
}
  0x46   : > { %s1978_s13 = scalar_lea.vmem %s251_s18, 1024  ;;  %p1986_p1 = scmp.lt.s32.totalorder %s251_s18, %s251_s18 }
  0x47   : > { %p1979_p7 = scmp.ne.s32.totalorder %s251_s18, %s1978_s13  ;;  %p1987_p4 = scmp.lt.s32.totalorder %s1978_s13, %s1978_s13 }
  0x49   : > { %p1981_p9 = pnand %p1979_p7, %p2274_p10  ;;  %p1988_p5 = por %p1987_p4, %p1986_p1 }
  0x4b   : > { %p1982_p11 = pneg %p1981_p9 }
  0x4d   : > { %p1989_p6 = pnand %p1988_p5, %p1982_p11 }
  0x4f   : > { %1992 = shalt.err (!%p1989_p6)
}
  0x50   : > { %1774 = dma.hbm_to_vmem [thread:$0]  (!%p2258_p8), %s2689_s2, 1024, %s251_s18, [#allocation7], %s2158_s12, %s2158_s12, %s2159_s15  }
  0x51   : > { %s2160_s19 = smov [#allocation11]   ;;  %s1993_s23 = scalar_lea.hbm %s2692_s5, 2048 }
  0x52   : > { %s279_s20 = sshll.u32 %s2160_s19, 4  ;;  %p1994_p5 = scmp.ne.s32.totalorder %s2692_s5, %s1993_s23  ;;  %s280_s20 = int_to_ptr.vmem [resolvable:$true] %s279_s20 }
  0x53   : > { %p2000_p13 = scmp.lt.u32.totalorder %s1993_s23, %s2692_s5 }
  0x54   : > { %p1996_p6 = pnand %p1994_p5, %p2274_p10 }
  0x56   : > { %p1997_p12 = pneg %p1996_p6 }
  0x58   : > { %p2002_p0 = pnand %p2000_p13, %p1997_p12 }
  0x5a   : > { %2005 = shalt.err (!%p2002_p0)
}
  0x5b   : > { %s2006_s18 = scalar_lea.vmem %s280_s20, 2048  ;;  %p2014_p9 = scmp.lt.s32.totalorder %s280_s20, %s280_s20 }
  0x5c   : > { %p2007_p2 = scmp.ne.s32.totalorder %s280_s20, %s2006_s18  ;;  %p2015_p11 = scmp.lt.s32.totalorder %s2006_s18, %s2006_s18 }
  0x5e   : > { %p2009_p3 = pnand %p2007_p2, %p2274_p10  ;;  %p2016_p1 = por %p2015_p11, %p2014_p9 }
  0x60   : > { %p2010_p7 = pneg %p2009_p3 }
  0x62   : > { %p2017_p4 = pnand %p2016_p1, %p2010_p7 }
  0x64   : > { %2020 = shalt.err (!%p2017_p4)
}
  0x65   : > { %s2161_s16 = smov 128   ;;  %s2162_s24 = smov 8  }
  0x66   : > { %1780 = dma.hbm_to_vmem [thread:$0]  (!%p2258_p8), %s2692_s5, 2048, %s280_s20, [#allocation10], %s2161_s16, %s2161_s16, %s2162_s24  }
  0x67   : > { %s2365_s21 = sadd.s32 1, %s2153_s30   ;;  %s33_s23 = sadd.s32 1, %s2149_s29 }
  0x68   : > { %s30_s22 = ssub.s32 %s2153_s30, %s2365_s21  ;;  %p40_p5 = scmp.ne.s32.totalorder %s2149_s29, %s2145_s28 }
  0x69   : > { %p31_p10 = scmp.eq.s32.totalorder %s30_s22, 0  ;;  %p41_p6 = scmp.eq.s32.totalorder %s2153_s30, 0 }
  0x6a   : > { %p1789_p13 = scmp.lt.s32.totalorder %s2153_s30, 4  ;;  %s296_s26 = sand.u32 1, %s2149_s29  }
  0x6b   : > { %s2374_s25 = scalar_select %p31_p10, %s2149_s29, %s33_s23  }
  0x6c   : > { %p42_p12 = por %p41_p6, %p40_p5  ;;  %s1369_s27 = sshll.u32 %s2153_s30, 9 }
  0x6d   : > { %s1318_s13 = sshll.u32 %s296_s26, 5  ;;  %s2382_s17 = scalar_lea.hbm %s2687_s0, %s1369_s27 }
  0x6e   : > { %s300_s20 = scalar_lea.vmem [#allocation3], %s1318_s13  ;;  %p2384_p8 = pnand %p1789_p13, %p42_p12 }
  0x6f   : > { %s308_s16 = sshll.u32 %s300_s20, 4  ;;  %s2390_s30 = scalar_lea.sflag [#allocation4], %s296_s26  ;;  %s2388_s16 = int_to_ptr.vmem [resolvable:$true] %s308_s16 }
  0x70   : > { %s2021_s19 = scalar_lea.hbm %s2382_s17, 512  ;;  %p2023_p2 = pneg %p2384_p8 }
  0x71   : > { %p2022_p0 = scmp.ne.s32.totalorder %s2382_s17, %s2021_s19  ;;  %s2026_s27 = scalar_lea.hbm %s2687_s0, 2048 }
  0x72   : > { %p2027_p9 = scmp.lt.u32.totalorder %s2382_s17, %s2687_s0  ;;  %p2028_p11 = scmp.lt.u32.totalorder %s2026_s27, %s2021_s19 }
  0x73   : > { %p2024_p3 = pnand %p2023_p2, %p2022_p0  ;;  %p2030_p4 = scmp.lt.u32.totalorder %s2021_s19, %s2382_s17 }
  0x74   : > { %p2029_p1 = por %p2028_p11, %p2027_p9 }
  0x75   : > { %p2025_p7 = pneg %p2024_p3 }
  0x76   : > { %p2031_p10 = por %p2030_p4, %p2029_p1 }
  0x78   : > { %p2032_p5 = pnand %p2031_p10, %p2025_p7 }
  0x7a   : > { %2035 = shalt.err (!%p2032_p5)
}
  0x7b   : > { %s2036_s26 = scalar_lea.vmem %s2388_s16, 512  ;;  %s2163_s18 = smov [#allocation3]  }
  0x7c   : > { %p2037_p6 = scmp.ne.s32.totalorder %s2388_s16, %s2036_s26  ;;  %s2041_s20 = sshll.u32 %s2163_s18, 4  ;;  %s2042_s20 = int_to_ptr.vmem [resolvable:$false] %s2041_s20 }
  0x7d   : > { %s2043_s22 = scalar_lea.vmem %s2042_s20, 1024  ;;  %p2044_p0 = scmp.lt.s32.totalorder %s2388_s16, %s2042_s20 }
  0x7e   : > { %p2039_p12 = pnand %p2037_p6, %p2023_p2  ;;  %p2045_p3 = scmp.lt.s32.totalorder %s2043_s22, %s2036_s26 }
  0x80   : > { %p2040_p13 = pneg %p2039_p12  ;;  %p2046_p9 = por %p2045_p3, %p2044_p0 }
  0x82   : > { %p2047_p11 = pnand %p2046_p9, %p2040_p13 }
  0x84   : > { %2050 = shalt.err (!%p2047_p11)
}
  0x85   : > { %1784 = dma.hbm_to_vmem [thread:$0]  (!%p2384_p8), %s2382_s17, 512, %s2388_s16, %s2390_s30, %s2158_s12, %s2158_s12, %s2159_s15  }
  0x86   : > { %p2704_p2 = scmp.ne.s32.totalorder %s2700_s11, 0 }
  0x87   : > { %s322_s19 = sand.u32 (!%p2704_p2), 1, %s2145_s28   ;;  %p2705_p7 = scmp.ne.s32.totalorder (!%p2704_p2), %s2699_s10, 0 }
  0x88   : > { %320 = sbr.rel (%p2704_p2) target bundleno = 2128 (0x850), region = 48  ;;  %s1323_s23 = sshll.u32 (!%p2704_p2), %s322_s19, 5 }
  0x89   : > { %s323_s27 = scalar_lea.sflag (!%p2704_p2), [#allocation4], %s322_s19  ;;  %s2424_s13 = scalar_lea.vmem (!%p2704_p2), [#allocation3], %s1323_s23 }
  0x8f   : > { %2120 = dma.done.wait (%p2705_p7), %s323_s27, 512  }
  0x90   : > { %2122 = vsyncadd (%p2705_p7), %s323_s27, 4294966784  ;;  %p2706_p1 = scmp.eq.s32.totalorder %s2235_s9, 0 }
  0x92   : > { %2124 = dma.done.wait (%p2706_p1), [#allocation7], 2048   ;;  %p2707_p8 = pmov %p2706_p1 }
  0x93   : > { %p2708_p4 = pmov %p2706_p1 }
  0x94   : > { %2126 = vsyncadd (%p2707_p8), [#allocation7], 4294965248 }
  0x95   : > { %2128 = dma.done.wait (%p2708_p4), [#allocation10], 3072   ;;  %p2709_p10 = pmov %p2706_p1 }
  0x96   : > { %p2710_p5 = scmp.ne.s32.totalorder %s2235_s9, 0 }
  0x97   : > { %2130 = vsyncadd (%p2709_p10), [#allocation10], 4294964224  ;;  %v2164_v0 = vmov (!%p2710_p5), 0.0  }
  0x98   : > { %375 = sbr.rel (%p2710_p5) target bundleno = 159 (0x9f), region = 72  ;;  %376 = vst [vmem:[#allocation13] sm:$0xff] (!%p2710_p5), %v2164_v0  ;;  %377 = vst [vmem:[#allocation13 + $0x8] sm:$0xff] (!%p2710_p5), %v2164_v0 }
  0x99   : > { %378 = vst [vmem:[#allocation13 + $0x10] sm:$0xff] (!%p2710_p5), %v2164_v0  ;;  %379 = vst [vmem:[#allocation13 + $0x18] sm:$0xff] (!%p2710_p5), %v2164_v0 }
  0x9f PF: > { %v2440_v1 = vld [vmem:[#allocation6] sm:$0xff]   ;;  %v2165_v2 = vmov 0.0   ;;  %v2445_v3 = vld [vmem:[#allocation6 + $0x8] sm:$0xff]   ;;  %vm2166_vm0 = vmmov 0   ;;  %v2455_v4 = vld [vmem:[#allocation6 + $0x10] sm:$0xff]   ;;  %p1360_p6 = scmp.ne.s32.totalorder %s2235_s9, 3 }
  0xa0   : > { %1491 = vmatprep.subr.bf16.mxu0 %v2165_v2  ;;  %1511 = vmatprep.subr.bf16.mxu1 %v2165_v2  ;;  %v2459_v5 = vld [vmem:[#allocation6 + $0x18] sm:$0xff]   ;;  %v2465_v6 = vld [vmem:[#allocation6 + $0x20] sm:$0xff]   ;;  %v2471_v7 = vld [vmem:[#allocation6 + $0x28] sm:$0xff]  }
  0xa1   : > { %1492 = vmatpush3.bf16.msra.mxu0 %v2440_v1  ;;  %1507 = vmatprep.mubr.msk.bf16.mxu0 %vm2166_vm0, %v2165_v2  ;;  %v1851_v8 = vld [vmem:[#allocation6 + $0x30] sm:$0xff]   ;;  %v1852_v9 = vld [vmem:[#allocation6 + $0x38] sm:$0xff]   ;;  %v1371_v13 = vld [vmem:[%s2424_s13] sm:$0xff]  }
  0xa2   : > { %1493 = vmatprep.subr.bf16.mxu0 %v2165_v2  ;;  %1512 = vmatpush3.bf16.msra.mxu1 %v2440_v1  ;;  %v396_v10 = vld [vmem:[#allocation13] sm:$0xff]  ;;  %v397_v11 = vld [vmem:[#allocation13 + $0x8] sm:$0xff]  ;;  %v1372_v14 = vunpack.c.l.bf16 %v1371_v13  ;;  %v1373_v15 = vunpack.c.h.bf16 %v1371_v13  ;;  %v1853_v25 = vld [vmem:[#allocation8] sm:$0xff]  }
  0xa3   : > { %1513 = vmatprep.subr.bf16.mxu1 %v2165_v2  ;;  %1527 = vmatprep.mubr.msk.bf16.mxu1 %vm2166_vm0, %v2165_v2  ;;  %v402_v12 = vpack.c.bf16 %v397_v11, %v396_v10  ;;  %v1386_v26 = vld [vmem:[%s2424_s13 + $0x8] sm:$0xff]   ;;  %v1855_v39 = vld [vmem:[#allocation8 + $0x10] sm:$0xff]   ;;  %v1856_v40 = vld [vmem:[#allocation8 + $0x18] sm:$0xff]  }
  0xa4   : > { %v1376_v27 = vunpack.c.l.bf16 %v1386_v26  ;;  %v1377_v28 = vunpack.c.h.bf16 %v1386_v26  ;;  %v1854_v38 = vld [vmem:[#allocation8 + $0x8] sm:$0xff]   ;;  %v1857_v41 = vld [vmem:[#allocation8 + $0x20] sm:$0xff]   ;;  %v1859_v43 = vld [vmem:[#allocation8 + $0x30] sm:$0xff]  }
  0xa5   : > { %1494 = vmatpush3.bf16.msra.mxu0 %v2445_v3  ;;  %v1858_v42 = vld [vmem:[#allocation8 + $0x28] sm:$0xff]   ;;  %v1860_v44 = vld [vmem:[#allocation8 + $0x38] sm:$0xff]   ;;  %v2520_v45 = vld [vmem:[#allocation9] sm:$0xff]  }
  0xa6   : > { %1495 = vmatprep.subr.bf16.mxu0 %v2165_v2  ;;  %1514 = vmatpush3.bf16.msra.mxu1 %v2445_v3  ;;  %v2524_v46 = vld [vmem:[#allocation9 + $0x8] sm:$0xff]   ;;  %v2528_v47 = vld [vmem:[#allocation9 + $0x10] sm:$0xff]   ;;  %v2532_v48 = vld [vmem:[#allocation9 + $0x18] sm:$0xff]  }
  0xa7   : > { %1515 = vmatprep.subr.bf16.mxu1 %v2165_v2  ;;  %v2536_v49 = vld [vmem:[#allocation9 + $0x20] sm:$0xff]   ;;  %v2540_v50 = vld [vmem:[#allocation9 + $0x28] sm:$0xff]   ;;  %v2544_v51 = vld [vmem:[#allocation9 + $0x30] sm:$0xff]  }
  0xa8   : > { %v2548_v52 = vld [vmem:[#allocation9 + $0x38] sm:$0xff]   ;;  %v1387_v53 = vld [vmem:[%s2424_s13 + $0x10] sm:$0xff]   ;;  %v824_v13 = vld [vmem:[#allocation13 + $0x10] sm:$0xff] }
  0xa9   : > { %1496 = vmatpush3.bf16.msra.mxu0 %v2455_v4  ;;  %v1380_v54 = vunpack.c.l.bf16 %v1387_v53  ;;  %v1381_v55 = vunpack.c.h.bf16 %v1387_v53 }
  0xaa   : > { %1497 = vmatprep.subr.bf16.mxu0 %v2165_v2  ;;  %1516 = vmatpush3.bf16.msra.mxu1 %v2455_v4 }
  0xab   : > { %1517 = vmatprep.subr.bf16.mxu1 %v2165_v2 }
  0xad   : > { %1498 = vmatpush3.bf16.msra.mxu0 %v2459_v5 }
  0xae   : > { %1499 = vmatprep.subr.bf16.mxu0 %v2165_v2  ;;  %1518 = vmatpush3.bf16.msra.mxu1 %v2459_v5 }
  0xaf   : > { %1519 = vmatprep.subr.bf16.mxu1 %v2165_v2 }
  0xb1   : > { %1500 = vmatpush3.bf16.msra.mxu0 %v2465_v6 }
  0xb2   : > { %1501 = vmatprep.subr.bf16.mxu0 %v2165_v2  ;;  %1520 = vmatpush3.bf16.msra.mxu1 %v2465_v6 }
  0xb3   : > { %1521 = vmatprep.subr.bf16.mxu1 %v2165_v2 }
  0xb5   : > { %1502 = vmatpush3.bf16.msra.mxu0 %v2471_v7 }
  0xb6   : > { %1503 = vmatprep.subr.bf16.mxu0 %v2165_v2  ;;  %1522 = vmatpush3.bf16.msra.mxu1 %v2471_v7 }
  0xb7   : > { %1523 = vmatprep.subr.bf16.mxu1 %v2165_v2 }
  0xb9   : > { %1504 = vmatpush3.bf16.msra.mxu0 %v1851_v8 }
  0xba   : > { %1505 = vmatprep.subr.bf16.mxu0 %v2165_v2  ;;  %1524 = vmatpush3.bf16.msra.mxu1 %v1851_v8 }
  0xbb   : > { %1525 = vmatprep.subr.bf16.mxu1 %v2165_v2 }
  0xbd   : > { %1506 = vmatpush3.bf16.msra.mxu0 %v1852_v9 }
  0xbe   : > { %1526 = vmatpush3.bf16.msra.mxu1 %v1852_v9  ;;  %1531 = vmatprep.subr.bf16.mxu0 %v2165_v2 }
  0xbf   : > { %1551 = vmatprep.subr.bf16.mxu1 %v2165_v2 }
  0xc0   : > { %1508 = vmatmul.mubr.bf16.vlgmr.msra.gmra.mrb[0].mxu0 %v402_v12 }
  0xc1   : > { %1532 = vmatpush3.bf16.msra.mxu0 %v2440_v1  ;;  %1547 = vmatprep.mubr.msk.bf16.mxu0 %vm2166_vm0, %v2165_v2 }
  0xc2   : > { %1533 = vmatprep.subr.bf16.mxu0 %v2165_v2 }
  0xc5   : > { %1534 = vmatpush3.bf16.msra.mxu0 %v2445_v3 }
  0xc6   : > { %1535 = vmatprep.subr.bf16.mxu0 %v2165_v2 }
  0xc9   : > { %1536 = vmatpush3.bf16.msra.mxu0 %v2455_v4 }
  0xca   : > { %1537 = vmatprep.subr.bf16.mxu0 %v2165_v2 }
  0xcd   : > { %1538 = vmatpush3.bf16.msra.mxu0 %v2459_v5 }
  0xce   : > { %1539 = vmatprep.subr.bf16.mxu0 %v2165_v2 }
  0xd1   : > { %1540 = vmatpush3.bf16.msra.mxu0 %v2465_v6 }
  0xd2   : > { %1541 = vmatprep.subr.bf16.mxu0 %v2165_v2 }
  0xd5   : > { %1542 = vmatpush3.bf16.msra.mxu0 %v2471_v7 }
  0xd6   : > { %1543 = vmatprep.subr.bf16.mxu0 %v2165_v2 }
  0xd9   : > { %1544 = vmatpush3.bf16.msra.mxu0 %v1851_v8 }
  0xda   : > { %1545 = vmatprep.subr.bf16.mxu0 %v2165_v2 }
  0xdd   : > { %1546 = vmatpush3.bf16.msra.mxu0 %v1852_v9 }
  0xde   : > { %1571 = vmatprep.subr.bf16.mxu0 %v1853_v25 }
 0x193   : > { %v485_v16 = vpop.f32.mrb[0].mxu0 }
 0x194   : > { %v492_v17 = vadd.f32 %v1372_v14, %v485_v16  ;;  %v1509_v18 = vpop.f32.mrb[1].mxu0  ;;  %v825_v14 = vld [vmem:[#allocation13 + $0x18] sm:$0xff]  ;;  %v1388_v16 = vld [vmem:[%s2424_s13 + $0x18] sm:$0xff]  }
 0x195   : > { %v488_v19 = vpop.f32.mrb[2].mxu0  ;;  %v1385_v18 = vunpack.c.h.bf16 %v1388_v16 }
 0x196   : > { %v493_v20 = vadd.f32 %v1373_v15, %v488_v19  ;;  %v1510_v21 = vpop.f32.mrb[3].mxu0  ;;  %1869 = vtanh.f32 %v492_v17  ;;  %v829_v15 = vpack.c.bf16 %v825_v14, %v824_v13  ;;  %v1384_v17 = vunpack.c.l.bf16 %v1388_v16 }
 0x198   : > { %1871 = vtanh.f32 %v493_v20 }
 0x1a0   : > { %v1870_v22 = vpop.eup %1869 }
 0x1a2   : > { %v1872_v23 = vpop.eup %1871 }
 0x1a3   : > { %v496_v24 = vpack.c.bf16 %v1872_v23, %v1870_v22 }
 0x1a5   : > { %1528 = vmatmul.mubr.bf16.vlgmr.msra.gmra.mrb[0].mxu1 %v496_v24 }
 0x1a6   : > { %1552 = vmatpush3.bf16.msra.mxu1 %v2440_v1  ;;  %1567 = vmatprep.mubr.msk.bf16.mxu1 %vm2166_vm0, %v2165_v2 }
 0x1a7   : > { %1553 = vmatprep.subr.bf16.mxu1 %v2165_v2 }
 0x1aa   : > { %1554 = vmatpush3.bf16.msra.mxu1 %v2445_v3  ;;  %v2565_v3 = vld [vmem:[%s2691_s4] ss:$0 sm:$0xff] }
 0x1ab   : > { %1555 = vmatprep.subr.bf16.mxu1 %v2165_v2 }
 0x1ae   : > { %1556 = vmatpush3.bf16.msra.mxu1 %v2455_v4 }
 0x1af   : > { %1557 = vmatprep.subr.bf16.mxu1 %v2165_v2 }
 0x1b2   : > { %1558 = vmatpush3.bf16.msra.mxu1 %v2459_v5 }
 0x1b3   : > { %1559 = vmatprep.subr.bf16.mxu1 %v2165_v2 }
 0x1b6   : > { %1560 = vmatpush3.bf16.msra.mxu1 %v2465_v6 }
 0x1b7   : > { %1561 = vmatprep.subr.bf16.mxu1 %v2165_v2 }
 0x1ba   : > { %1562 = vmatpush3.bf16.msra.mxu1 %v2471_v7 }
 0x1bb   : > { %1563 = vmatprep.subr.bf16.mxu1 %v2165_v2 }
 0x1be   : > { %1564 = vmatpush3.bf16.msra.mxu1 %v1851_v8 }
 0x1bf   : > { %1565 = vmatprep.subr.bf16.mxu1 %v2165_v2 }
 0x1c2   : > { %1566 = vmatpush3.bf16.msra.mxu1 %v1852_v9 }
 0x1c3   : > { %1595 = vmatprep.subr.bf16.mxu1 %v2165_v2 }
 0x278   : > { %v537_v29 = vpop.f32.mrb[0].mxu1 }
 0x279   : > { %v544_v30 = vadd.f32 %v1376_v27, %v537_v29  ;;  %v1529_v31 = vpop.f32.mrb[1].mxu1 }
 0x27a   : > { %v540_v32 = vpop.f32.mrb[2].mxu1 }
 0x27b   : > { %v545_v33 = vadd.f32 %v1377_v28, %v540_v32  ;;  %v1530_v34 = vpop.f32.mrb[3].mxu1  ;;  %1873 = vtanh.f32 %v544_v30 }
 0x27d   : > { %1875 = vtanh.f32 %v545_v33 }
 0x285   : > { %v1874_v35 = vpop.eup %1873 }
 0x287   : > { %v1876_v36 = vpop.eup %1875 }
 0x288   : > { %v548_v37 = vpack.c.bf16 %v1876_v36, %v1874_v35 }
 0x28a   : > { %1548 = vmatmul.mubr.bf16.vlgmr.msra.gmra.mrb[4].mxu0 %v548_v37 }
 0x28b   : > { %1572 = vmatpush3.bf16.msra.mxu0 %v1853_v25  ;;  %1587 = vmatprep.mubr.bf16.mxu0 %v496_v24 }
 0x28c   : > { %1573 = vmatprep.subr.bf16.mxu0 %v1854_v38 }
 0x28f   : > { %1574 = vmatpush3.bf16.msra.mxu0 %v1854_v38 }
 0x290   : > { %1575 = vmatprep.subr.bf16.mxu0 %v1855_v39 }
 0x293   : > { %1576 = vmatpush3.bf16.msra.mxu0 %v1855_v39 }
 0x294   : > { %1577 = vmatprep.subr.bf16.mxu0 %v1856_v40 }
 0x297   : > { %1578 = vmatpush3.bf16.msra.mxu0 %v1856_v40 }
 0x298   : > { %1579 = vmatprep.subr.bf16.mxu0 %v1857_v41 }
 0x29b   : > { %1580 = vmatpush3.bf16.msra.mxu0 %v1857_v41 }
 0x29c   : > { %1581 = vmatprep.subr.bf16.mxu0 %v1858_v42 }
 0x29f   : > { %1582 = vmatpush3.bf16.msra.mxu0 %v1858_v42 }
 0x2a0   : > { %1583 = vmatprep.subr.bf16.mxu0 %v1859_v43 }
 0x2a3   : > { %1584 = vmatpush3.bf16.msra.mxu0 %v1859_v43 }
 0x2a4   : > { %1585 = vmatprep.subr.bf16.mxu0 %v1860_v44 }
 0x2a7   : > { %1586 = vmatpush3.bf16.msra.mxu0 %v1860_v44 }
 0x2a8   : > { %1615 = vmatprep.subr.bf16.mxu0 %v2165_v2 }
 0x2aa   : > { %1588 = vmatmul.mubr.bf16.vlgmr.msra.gmra.mrb[8].mxu0 %v548_v37 }
 0x2ab   : > { %1616 = vmatpush3.bf16.msra.mxu0 %v2520_v45 }
 0x2ac   : > { %1617 = vmatprep.subr.bf16.mxu0 %v2165_v2 }
 0x2af   : > { %1618 = vmatpush3.bf16.msra.mxu0 %v2524_v46 }
 0x2b0   : > { %1619 = vmatprep.subr.bf16.mxu0 %v2165_v2 }
 0x2b3   : > { %1620 = vmatpush3.bf16.msra.mxu0 %v2528_v47 }
 0x2b4   : > { %1621 = vmatprep.subr.bf16.mxu0 %v2165_v2 }
 0x2b7   : > { %1622 = vmatpush3.bf16.msra.mxu0 %v2532_v48 }
 0x2b8   : > { %1623 = vmatprep.subr.bf16.mxu0 %v2165_v2 }
 0x2bb   : > { %1624 = vmatpush3.bf16.msra.mxu0 %v2536_v49 }
 0x2bc   : > { %1625 = vmatprep.subr.bf16.mxu0 %v2165_v2 }
 0x2bf   : > { %1626 = vmatpush3.bf16.msra.mxu0 %v2540_v50 }
 0x2c0   : > { %1627 = vmatprep.subr.bf16.mxu0 %v2165_v2 }
 0x2c3   : > { %1628 = vmatpush3.bf16.msra.mxu0 %v2544_v51 }
 0x2c4   : > { %1629 = vmatprep.subr.bf16.mxu0 %v2165_v2 }
 0x2c7   : > { %1630 = vmatpush3.bf16.msra.mxu0 %v2548_v52 }
 0x2c8   : > { %1655 = vmatprep.subr.bf16.mxu0 %v2165_v2 }
 0x35d   : > { %v590_v56 = vpop.f32.mrb[4].mxu0 }
 0x35e   : > { %v597_v57 = vadd.f32 %v1380_v54, %v590_v56  ;;  %v1549_v58 = vpop.f32.mrb[5].mxu0 }
 0x35f   : > { %v593_v59 = vpop.f32.mrb[6].mxu0 }
 0x360   : > { %v598_v60 = vadd.f32 %v1381_v55, %v593_v59  ;;  %v1550_v61 = vpop.f32.mrb[7].mxu0  ;;  %1877 = vtanh.f32 %v597_v57 }
 0x362   : > { %1879 = vtanh.f32 %v598_v60 }
 0x36a   : > { %v1878_v62 = vpop.eup %1877 }
 0x36c   : > { %v1880_v63 = vpop.eup %1879 }
 0x36d   : > { %v601_v0 = vpack.c.bf16 %v1880_v63, %v1878_v62 }
 0x36f   : > { %1568 = vmatmul.mubr.bf16.vlgmr.msra.gmra.mrb[4].mxu1 %v601_v0  ;;  %1591 = vmatprep.mubr.bf16.mxu0 %v601_v0 }
 0x370   : > { %1596 = vmatpush3.bf16.msra.mxu1 %v2520_v45  ;;  %1611 = vmatprep.mubr.msk.bf16.mxu1 %vm2166_vm0, %v2165_v2 }
 0x371   : > { %1597 = vmatprep.subr.bf16.mxu1 %v2165_v2 }
 0x374   : > { %1598 = vmatpush3.bf16.msra.mxu1 %v2524_v46 }
 0x375   : > { %1599 = vmatprep.subr.bf16.mxu1 %v2165_v2 }
 0x378   : > { %1600 = vmatpush3.bf16.msra.mxu1 %v2528_v47 }
 0x379   : > { %1601 = vmatprep.subr.bf16.mxu1 %v2165_v2 }
 0x37c   : > { %1602 = vmatpush3.bf16.msra.mxu1 %v2532_v48 }
 0x37d   : > { %v1589_v1 = vpop.f32.mrb[8].mxu0  ;;  %1603 = vmatprep.subr.bf16.mxu1 %v2165_v2 }
 0x37e   : > { %v768_v4 = vpop.f32.mrb[9].mxu0  ;;  %v777_v6 = vadd.f32 %v1589_v1, %v2565_v3 }
 0x37f   : > { %v1590_v5 = vpop.f32.mrb[10].mxu0  ;;  %v769_v9 = vadd.f32 %v2565_v3, %v768_v4 }
 0x380   : > { %v780_v7 = vadd.f32 %v1590_v5, %v2565_v3  ;;  %v771_v8 = vpop.f32.mrb[11].mxu0  ;;  %1604 = vmatpush3.bf16.msra.mxu1 %v2536_v49 }
 0x381   : > { %v772_v10 = vadd.f32 %v2565_v3, %v771_v8  ;;  %1605 = vmatprep.subr.bf16.mxu1 %v2165_v2 }
 0x382   : > { %v2574_v11 = vpack.c.bf16 %v780_v7, %v777_v6 }
 0x383   : > { %v799_v12 = vpack.c.bf16 %v772_v10, %v769_v9 }
 0x384   : > { %1606 = vmatpush3.bf16.msra.mxu1 %v2540_v50 }
 0x385   : > { %1607 = vmatprep.subr.bf16.mxu1 %v2165_v2  ;;  %v827_v28 = vunpack.c.l.bf16 %v799_v12  ;;  %v828_v32 = vunpack.c.h.bf16 %v799_v12 }
 0x388   : > { %1608 = vmatpush3.bf16.msra.mxu1 %v2544_v51 }
 0x389   : > { %1609 = vmatprep.subr.bf16.mxu1 %v2165_v2 }
 0x38c   : > { %1610 = vmatpush3.bf16.msra.mxu1 %v2548_v52 }
 0x38d   : > { %1635 = vmatprep.subr.bf16.mxu1 %v2165_v2 }
 0x38f   : > { %1612 = vmatmul.mubr.bf16.vlgmr.msra.gmra.mrb[8].mxu1 %v829_v15 }
 0x390   : > { %1636 = vmatpush3.bf16.msra.mxu1 %v2520_v45  ;;  %1651 = vmatprep.mubr.msk.bf16.mxu1 %vm2166_vm0, %v2165_v2 }
 0x391   : > { %1637 = vmatprep.subr.bf16.mxu1 %v2165_v2 }
 0x394   : > { %1638 = vmatpush3.bf16.msra.mxu1 %v2524_v46 }
 0x395   : > { %1639 = vmatprep.subr.bf16.mxu1 %v2165_v2 }
 0x398   : > { %1640 = vmatpush3.bf16.msra.mxu1 %v2528_v47 }
 0x399   : > { %1641 = vmatprep.subr.bf16.mxu1 %v2165_v2 }
 0x39c   : > { %1642 = vmatpush3.bf16.msra.mxu1 %v2532_v48 }
 0x39d   : > { %1643 = vmatprep.subr.bf16.mxu1 %v2165_v2 }
 0x3a0   : > { %1644 = vmatpush3.bf16.msra.mxu1 %v2536_v49 }
 0x3a1   : > { %1645 = vmatprep.subr.bf16.mxu1 %v2165_v2 }
 0x3a4   : > { %1646 = vmatpush3.bf16.msra.mxu1 %v2540_v50 }
 0x3a5   : > { %1647 = vmatprep.subr.bf16.mxu1 %v2165_v2 }
 0x3a8   : > { %1648 = vmatpush3.bf16.msra.mxu1 %v2544_v51 }
 0x3a9   : > { %1649 = vmatprep.subr.bf16.mxu1 %v2165_v2 }
 0x3ac   : > { %1650 = vmatpush3.bf16.msra.mxu1 %v2548_v52 }
 0x442   : > { %v643_v19 = vpop.f32.mrb[4].mxu1 }
 0x443   : > { %v650_v20 = vadd.f32 %v1384_v17, %v643_v19  ;;  %v1569_v21 = vpop.f32.mrb[5].mxu1  ;;  %v1078_v17 = vld [vmem:[#allocation11] sm:$0xff] (!%p1360_p6)  ;;  %v1080_v19 = vld [vmem:[#allocation11 + $0x10] sm:$0xff] (!%p1360_p6) }
 0x444   : > { %v646_v22 = vpop.f32.mrb[6].mxu1  ;;  %v1081_v21 = vld [vmem:[#allocation11 + $0x18] sm:$0xff] (!%p1360_p6) }
 0x445   : > { %1881 = vtanh.f32 %v650_v20  ;;  %v651_v23 = vadd.f32 %v1385_v18, %v646_v22  ;;  %v1570_v24 = vpop.f32.mrb[7].mxu1  ;;  %v1079_v18 = vld [vmem:[#allocation11 + $0x8] sm:$0xff] (!%p1360_p6)  ;;  %v1714_v22 = vpack.c.bf16 (!%p1360_p6), %v1081_v21, %v1080_v19 }
 0x446   : > { %v1710_v20 = vpack.c.bf16 (!%p1360_p6), %v1079_v18, %v1078_v17  ;;  %v1083_v24 = vld [vmem:[#allocation11 + $0x28] sm:$0xff] (!%p1360_p6) }
 0x447   : > { %1883 = vtanh.f32 %v651_v23  ;;  %v1082_v23 = vld [vmem:[#allocation11 + $0x20] sm:$0xff] (!%p1360_p6) }
 0x44f   : > { %v1882_v25 = vpop.eup %1881 }
 0x450   : > { %657 = vst [vmem:[#allocation13] sm:$0xff] %v1882_v25 }
 0x451   : > { %v1884_v26 = vpop.eup %1883 }
 0x452   : > { %658 = vst [vmem:[#allocation13 + $0x8] sm:$0xff] %v1884_v26  ;;  %v654_v27 = vpack.c.bf16 %v1884_v26, %v1882_v25  ;;  %v1718_v25 = vpack.c.bf16 (!%p1360_p6), %v1083_v24, %v1082_v23 }
 0x454   : > { %1592 = vmatmul.mubr.bf16.gmra.mrb[12].mxu0 %v654_v27  ;;  %v1084_v27 = vld [vmem:[#allocation11 + $0x30] sm:$0xff] (!%p1360_p6) }
 0x455   : > { %1631 = vmatprep.mubr.msk.bf16.mxu0 %vm2166_vm0, %v2165_v2 }
 0x462   : > { %v912_v29 = vpop.f32.mrb[8].mxu1 }
 0x463   : > { %v919_v30 = vadd.f32 %v912_v29, %v827_v28  ;;  %v1613_v31 = vpop.f32.mrb[9].mxu1  ;;  %v1085_v28 = vld [vmem:[#allocation11 + $0x38] sm:$0xff] (!%p1360_p6) }
 0x464   : > { %v915_v33 = vpop.f32.mrb[10].mxu1  ;;  %v1722_v29 = vpack.c.bf16 (!%p1360_p6), %v1085_v28, %v1084_v27  ;;  %v1087_v31 = vld [vmem:[#allocation11 + $0x48] sm:$0xff] (!%p1360_p6) }
 0x465   : > { %v920_v34 = vadd.f32 %v915_v33, %v828_v32  ;;  %v1614_v35 = vpop.f32.mrb[11].mxu1  ;;  %1885 = vtanh.f32 %v919_v30  ;;  %v1086_v30 = vld [vmem:[#allocation11 + $0x40] sm:$0xff] (!%p1360_p6)  ;;  %v1088_v33 = vld [vmem:[#allocation11 + $0x50] sm:$0xff] (!%p1360_p6) }
 0x466   : > { %v1726_v32 = vpack.c.bf16 (!%p1360_p6), %v1087_v31, %v1086_v30 }
 0x467   : > { %1887 = vtanh.f32 %v920_v34  ;;  %v1089_v34 = vld [vmem:[#allocation11 + $0x58] sm:$0xff] (!%p1360_p6) }
 0x468   : > { %v1730_v35 = vpack.c.bf16 (!%p1360_p6), %v1089_v34, %v1088_v33 }
 0x46f   : > { %v1886_v36 = vpop.eup %1885 }
 0x471   : > { %v1888_v37 = vpop.eup %1887 }
 0x472   : > { %v926_v38 = vpack.c.bf16 %v1888_v37, %v1886_v36  ;;  %v1090_v36 = vld [vmem:[#allocation11 + $0x60] sm:$0xff] (!%p1360_p6)  ;;  %v1091_v37 = vld [vmem:[#allocation11 + $0x68] sm:$0xff] (!%p1360_p6) }
 0x474   : > { %1632 = vmatmul.mubr.bf16.vlgmr.msra.gmra.mrb[16].mxu0 %v926_v38  ;;  %v1734_v38 = vpack.c.bf16 (!%p1360_p6), %v1091_v37, %v1090_v36 }
 0x475   : > { %1656 = vmatpush3.bf16.msra.mxu0 %v2520_v45  ;;  %1671 = vmatprep.mubr.msk.bf16.mxu0 %vm2166_vm0, %v2165_v2 }
 0x476   : > { %1657 = vmatprep.subr.bf16.mxu0 %v2165_v2 }
 0x479   : > { %1658 = vmatpush3.bf16.msra.mxu0 %v2524_v46 }
 0x47a   : > { %1659 = vmatprep.subr.bf16.mxu0 %v2165_v2 }
 0x47d   : > { %1660 = vmatpush3.bf16.msra.mxu0 %v2528_v47 }
 0x47e   : > { %1661 = vmatprep.subr.bf16.mxu0 %v2165_v2 }
 0x481   : > { %1662 = vmatpush3.bf16.msra.mxu0 %v2532_v48 }
 0x482   : > { %1663 = vmatprep.subr.bf16.mxu0 %v2165_v2 }
 0x485   : > { %1664 = vmatpush3.bf16.msra.mxu0 %v2536_v49  ;;  %v924_v49 = vunpack.c.l.bf16 %v2574_v11 }
 0x486   : > { %1665 = vmatprep.subr.bf16.mxu0 %v2165_v2 }
 0x489   : > { %1666 = vmatpush3.bf16.msra.mxu0 %v2540_v50 }
 0x48a   : > { %1667 = vmatprep.subr.bf16.mxu0 %v2165_v2 }
 0x48d   : > { %1668 = vmatpush3.bf16.msra.mxu0 %v2544_v51 }
 0x48e   : > { %1669 = vmatprep.subr.bf16.mxu0 %v2165_v2 }
 0x491   : > { %1670 = vmatpush3.bf16.msra.mxu0 %v2548_v52  ;;  %v925_v52 = vunpack.c.h.bf16 %v2574_v11 }
 0x492   : > { %1711 = vmatprep.subr.bf16.mxu0 (!%p1360_p6), %v1710_v20 }
 0x527   : > { %v1593_v39 = vpop.f32.mrb[12].mxu0 }
 0x528   : > { %v784_v40 = vpop.f32.mrb[13].mxu0  ;;  %v793_v42 = vadd.f32 %v1593_v39, %v2565_v3  ;;  %v1092_v39 = vld [vmem:[#allocation11 + $0x70] sm:$0xff] (!%p1360_p6) }
 0x529   : > { %v1594_v41 = vpop.f32.mrb[14].mxu0  ;;  %v785_v45 = vadd.f32 %v2565_v3, %v784_v40  ;;  %v1093_v40 = vld [vmem:[#allocation11 + $0x78] sm:$0xff] (!%p1360_p6) }
 0x52a   : > { %v796_v43 = vadd.f32 %v1594_v41, %v2565_v3  ;;  %v787_v44 = vpop.f32.mrb[15].mxu0  ;;  %v1738_v41 = vpack.c.bf16 (!%p1360_p6), %v1093_v40, %v1092_v39 }
 0x52b   : > { %v788_v46 = vadd.f32 %v2565_v3, %v787_v44 }
 0x52c   : > { %v802_v47 = vpack.c.bf16 %v796_v43, %v793_v42  ;;  %v1361_v43 = vld [vmem:[%s2693_s6] ss:$0 sm:$0xff] (!%p1360_p6) }
 0x52d   : > { %v801_v48 = vpack.c.bf16 %v788_v46, %v785_v45 }
 0x52e   : > { %v1022_v7 = vunpack.c.l.bf16 %v802_v47  ;;  %v1023_v11 = vunpack.c.h.bf16 %v802_v47 }
 0x52f   : > { %v973_v59 = vunpack.c.l.bf16 %v801_v48  ;;  %v974_v63 = vunpack.c.h.bf16 %v801_v48 }
 0x547   : > { %v961_v50 = vpop.f32.mrb[16].mxu0 }
 0x548   : > { %v968_v2 = vadd.f32 %v961_v50, %v924_v49  ;;  %v1633_v51 = vpop.f32.mrb[17].mxu0 }
 0x549   : > { %v964_v53 = vpop.f32.mrb[18].mxu0 }
 0x54a   : > { %v969_v54 = vadd.f32 %v964_v53, %v925_v52  ;;  %v1634_v55 = vpop.f32.mrb[19].mxu0  ;;  %1889 = vtanh.f32 %v968_v2 }
 0x54c   : > { %1891 = vtanh.f32 %v969_v54 }
 0x554   : > { %v1890_v56 = vpop.eup %1889 }
 0x556   : > { %v1892_v57 = vpop.eup %1891 }
 0x557   : > { %v975_v58 = vpack.c.bf16 %v1892_v57, %v1890_v56 }
 0x559   : > { %1652 = vmatmul.mubr.bf16.vlgmr.msra.gmra.mrb[12].mxu1 %v975_v58 }
 0x62c   : > { %v1010_v60 = vpop.f32.mrb[12].mxu1 }
 0x62d   : > { %v1017_v61 = vadd.f32 %v1010_v60, %v973_v59  ;;  %v1653_v62 = vpop.f32.mrb[13].mxu1 }
 0x62e   : > { %v1013_v0 = vpop.f32.mrb[14].mxu1 }
 0x62f   : > { %v1018_v1 = vadd.f32 %v1013_v0, %v974_v63  ;;  %v1654_v3 = vpop.f32.mrb[15].mxu1  ;;  %1893 = vtanh.f32 %v1017_v61 }
 0x631   : > { %1895 = vtanh.f32 %v1018_v1 }
 0x639   : > { %v1894_v4 = vpop.eup %1893 }
 0x63b   : > { %v1896_v5 = vpop.eup %1895 }
 0x63c   : > { %v1024_v6 = vpack.c.bf16 %v1896_v5, %v1894_v4 }
 0x63e   : > { %1672 = vmatmul.mubr.bf16.vlgmr.msra.gmra.mrb[20].mxu0 %v1024_v6 }
 0x63f   : > { %1713 = vmatpush3.bf16.msra.mxu0 (!%p1360_p6), %v1710_v20 }
 0x640   : > { %1715 = vmatprep.subr.bf16.mxu0 (!%p1360_p6), %v1714_v22 }
 0x643   : > { %1717 = vmatpush3.bf16.msra.mxu0 (!%p1360_p6), %v1714_v22 }
 0x644   : > { %1719 = vmatprep.subr.bf16.mxu0 (!%p1360_p6), %v1718_v25 }
 0x647   : > { %1721 = vmatpush3.bf16.msra.mxu0 (!%p1360_p6), %v1718_v25 }
 0x648   : > { %1723 = vmatprep.subr.bf16.mxu0 (!%p1360_p6), %v1722_v29 }
 0x64b   : > { %1725 = vmatpush3.bf16.msra.mxu0 (!%p1360_p6), %v1722_v29 }
 0x64c   : > { %1727 = vmatprep.subr.bf16.mxu0 (!%p1360_p6), %v1726_v32 }
 0x64f   : > { %1729 = vmatpush3.bf16.msra.mxu0 (!%p1360_p6), %v1726_v32 }
 0x650   : > { %1731 = vmatprep.subr.bf16.mxu0 (!%p1360_p6), %v1730_v35 }
 0x653   : > { %1733 = vmatpush3.bf16.msra.mxu0 (!%p1360_p6), %v1730_v35 }
 0x654   : > { %1735 = vmatprep.subr.bf16.mxu0 (!%p1360_p6), %v1734_v38 }
 0x657   : > { %1737 = vmatpush3.bf16.msra.mxu0 (!%p1360_p6), %v1734_v38 }
 0x658   : > { %1739 = vmatprep.subr.bf16.mxu0 (!%p1360_p6), %v1738_v41 }
 0x65b   : > { %1741 = vmatpush3.bf16.msra.mxu0 (!%p1360_p6), %v1738_v41 }
 0x711   : > { %v1059_v8 = vpop.f32.mrb[20].mxu0 }
 0x712   : > { %v1066_v9 = vadd.f32 %v1059_v8, %v1022_v7  ;;  %v1673_v10 = vpop.f32.mrb[21].mxu0 }
 0x713   : > { %v1062_v12 = vpop.f32.mrb[22].mxu0 }
 0x714   : > { %1897 = vtanh.f32 %v1066_v9  ;;  %v1067_v13 = vadd.f32 %v1062_v12, %v1023_v11  ;;  %v1674_v14 = vpop.f32.mrb[23].mxu0 }
 0x716   : > { %1899 = vtanh.f32 %v1067_v13 }
 0x71b   : > { %1075 = sbr.rel (%p1360_p6) target bundleno = 2077 (0x81d), region = 76 }
 0x71e   : > { %v1898_v15 = vpop.eup %1897 }
 0x71f   : > { %1070 = vst [vmem:[#allocation13 + $0x10] sm:$0xff] %v1898_v15 }
 0x720   : > { %v1900_v16 = vpop.eup %1899 }
 0x721   : > { %1071 = vst [vmem:[#allocation13 + $0x18] sm:$0xff] %v1900_v16 }
 0x726   : > { %v1076_v26 = vld [vmem:[#allocation13 + $0x10] sm:$0xff] }
 0x727   : > { %1707 = vmatprep.mubr.f32.mxu0 %v1076_v26 }
 0x728   : > { %v1077_v42 = vld [vmem:[#allocation13 + $0x18] sm:$0xff] }
 0x729   : > { %1708 = vmatmul.mubr.f32.vlgmr.msra.gmra.mrb[0].mxu0 %v1077_v42 }
 0x7fc   : > { %v1709_v44 = vpop.f32.mrb[0].mxu0 }
 0x7fd   : > { %v1173_v45 = vadd.f32 %v1709_v44, %v1361_v43  ;;  %v1167_v46 = vpop.f32.mrb[1].mxu0 }
 0x7fe   : > { %v1168_v47 = vadd.f32 %v1361_v43, %v1167_v46 }
 0x7ff   : > { %v1177_v48 = vsub.f32 0.0, %v1173_v45 }
 0x800   : > { %v1176_v49 = vsub.f32 0.0, %v1168_v47 }
 0x801   : > { %v1180_v50 = vmul.f32 1.442695, %v1177_v48 }
 0x802   : > { %v1178_v2 = vmul.f32 1.442695, %v1176_v49 }
 0x803   : > { %1901 = vpow2.f32 %v1180_v50 }
 0x804   : > { %1903 = vpow2.f32 %v1178_v2 }
 0x80d   : > { %v1902_v51 = vpop.eup %1901 }
 0x80e   : > { %v1904_v52 = vpop.eup %1903  ;;  %v1183_v53 = vadd.f32 1.0, %v1902_v51 }
 0x80f   : > { %v1182_v54 = vadd.f32 1.0, %v1904_v52 }
 0x810   : > { %1905 = vrcp.f32 %v1183_v53 }
 0x811   : > { %1907 = vrcp.f32 %v1182_v54 }
 0x81a   : > { %v1906_v55 = vpop.eup %1905 }
 0x81b   : > { %v1908_v56 = vpop.eup %1907  ;;  %1189 = vst [vmem:[#allocation12 + $0x8] sm:$0xff] %v1906_v55 }
 0x81c   : > { %1188 = vst [vmem:[#allocation12] sm:$0xff] %v1908_v56 }
 0x81d PF: > { %p1794_p12 = scmp.eq.s32.totalorder %s2235_s9, 3  ;;  %s2167_s17 = smov [#allocation12]  }
 0x81e   : > { %s1196_s16 = sshll.u32 %s2167_s17, 4  ;;  %s1197_s16 = int_to_ptr.vmem [resolvable:$true] %s1196_s16 }
 0x81f   : > { %s2051_s24 = scalar_lea.vmem %s1197_s16, 256  ;;  %p2058_p9 = scmp.lt.s32.totalorder %s1197_s16, %s1197_s16 }
 0x820   : > { %p2052_p13 = scmp.ne.s32.totalorder %s1197_s16, %s2051_s24  ;;  %p2059_p11 = scmp.lt.s32.totalorder %s2051_s24, %s2051_s24 }
 0x822   : > { %p2053_p0 = pnand %p2052_p13, %p1794_p12  ;;  %p2060_p2 = por %p2059_p11, %p2058_p9 }
 0x824   : > { %p2054_p3 = pneg %p2053_p0 }
 0x826   : > { %p2061_p7 = pnand %p2060_p2, %p2054_p3 }
 0x828   : > { %2064 = shalt.err (!%p2061_p7)
}
 0x829   : > { %s2065_s26 = scalar_lea.hbm %s2694_s7, 256 }
 0x82a   : > { %p2066_p1 = scmp.ne.s32.totalorder %s2694_s7, %s2065_s26  ;;  %p2071_p10 = scmp.lt.u32.totalorder %s2065_s26, %s2694_s7 }
 0x82c   : > { %p2067_p8 = pnand %p2066_p1, %p1794_p12 }
 0x82e   : > { %p2068_p4 = pneg %p2067_p8 }
 0x830   : > { %p2073_p5 = pnand %p2071_p10, %p2068_p4 }
 0x832   : > { %2076 = shalt.err (!%p2073_p5)
}
 0x833   : > { %s2168_s23 = smov 128   ;;  %s2169_s27 = smov 8  }
 0x834   : > { %1761 = dma.vmem_to_hbm [thread:$0]  (%p1794_p12), %s1197_s16, 256, %s2694_s7, [#allocation5], %s2168_s23, %s2168_s23, %s2169_s27  }
 0x835   : > { %s2170_s11 = smov [#allocation13]  }
 0x836   : > { %s1209_s12 = sshll.u32 %s2170_s11, 4  ;;  %s1210_s12 = int_to_ptr.vmem [resolvable:$true] %s1209_s12 }
 0x837   : > { %s2077_s15 = scalar_lea.vmem %s1210_s12, 512  ;;  %p2084_p3 = scmp.lt.s32.totalorder %s1210_s12, %s1210_s12 }
 0x838   : > { %p2078_p6 = scmp.ne.s32.totalorder %s1210_s12, %s2077_s15  ;;  %p2085_p9 = scmp.lt.s32.totalorder %s2077_s15, %s2077_s15 }
 0x83a   : > { %p2079_p13 = pnand %p2078_p6, %p1794_p12  ;;  %p2086_p11 = por %p2085_p9, %p2084_p3 }
 0x83c   : > { %p2080_p0 = pneg %p2079_p13 }
 0x83e   : > { %p2087_p2 = pnand %p2086_p11, %p2080_p0 }
 0x840   : > { %2090 = shalt.err (!%p2087_p2)
}
 0x841   : > { %s2091_s30 = scalar_lea.hbm %s2695_s8, 512 }
 0x842   : > { %p2092_p7 = scmp.ne.s32.totalorder %s2695_s8, %s2091_s30  ;;  %p2097_p4 = scmp.lt.u32.totalorder %s2091_s30, %s2695_s8 }
 0x844   : > { %p2093_p1 = pnand %p2092_p7, %p1794_p12 }
 0x846   : > { %p2094_p8 = pneg %p2093_p1 }
 0x848   : > { %p2099_p10 = pnand %p2097_p4, %p2094_p8 }
 0x84a   : > { %2102 = shalt.err (!%p2099_p10)
}
 0x84b   : > { %1763 = dma.vmem_to_hbm [thread:$0]  (%p1794_p12), %s1210_s12, 512, %s2695_s8, [#allocation14], %s2168_s23, %s2168_s23, %s2169_s27  }
 0x84c   : > { %2132 = dma.done.wait (%p1794_p12), [#allocation5], 256  }
 0x84d   : > { %2134 = vsyncadd (%p1794_p12), [#allocation5], 4294967040 }
 0x84e   : > { %2136 = dma.done.wait (%p1794_p12), [#allocation14], 512  }
 0x84f   : > { %2138 = vsyncadd (%p1794_p12), [#allocation14], 4294966784 }
 0x850 PF: > { %p23_p5 = scmp.ge.s32.totalorder %s2365_s21, 6   ;;  %s2711_s27 = smov %s2145_s28 }
 0x851   : > { %s2712_s28 = smov %s2149_s29  ;;  %s2713_s29 = smov %s2374_s25 }
 0x852   : > { %s2714_s30 = smov %s2365_s21  ;;  %25 = sbr.rel (!%p23_p5) target bundleno = 7 (0x7), region = 124 }
 0x859   :  { %1229 = vsyncpa [#allocation4], 1 }
 0x85a   :  { %1231 = vsyncpa [#allocation4 + $0x1], 1 }
 0x85b   :  { %1232 = vsyncpa [#allocation7], 1 }
 0x85c   :  { %1233 = vsyncpa [#allocation10], 1 }
 0x85d   :  { %1234 = vsyncpa [#allocation5], 1 }
 0x85e   :  { %1236 = vsyncpa [#allocation5 + $0x1], 1 }
 0x85f   :  { %1237 = vsyncpa [#allocation14], 1 }

</bundles_post_ra>
